<compile_context>
chip_gen: v5e
topology: v5e:2x2
jax: 0.10.0
libtpu: 0.0.40
codegen_flags: <defaults>
</compile_context>

<pallas_src>
import math
import functools

import jax
import jax.numpy as jnp
from jax.experimental import pallas as pl
from jax.experimental.pallas import tpu as pltpu


LN_EPS = 1e-5  # PyTorch nn.LayerNorm default


def _layer_norm(x, gamma, beta, eps=LN_EPS):
    """LayerNorm over the last dim (f32 elementwise math)."""
    mu = jnp.mean(x, axis=-1, keepdims=True)
    xc = x - mu
    var = jnp.mean(xc * xc, axis=-1, keepdims=True)
    return xc * jax.lax.rsqrt(var + eps) * gamma + beta


def encoder_layer_kernel(xq_ref, xkv_ref, wq_ref, wkv_ref, w1_ref, b1_ref,
                         w2_ref, b2_ref, g1_ref, be1_ref, g2_ref, be2_ref,
                         out_ref,
                         q3_ref, k3_ref, v3_ref, m_ref, l_ref, acc_ref, attn_ref,
                         *, heads):
    # xq_ref : (tq, D)   query-row tile of x (also the residual stream rows), input dtype
    # xkv_ref: (S,  D)   full sequence in bf16 (K/V source; q = k = v = x here)
    # wq_ref : (D, D)    bf16, 1/sqrt(hd) pre-folded
    # wkv_ref: (D, 2D)   bf16, [Wk^T | Wv^T] concatenated (split at lane offset D)
    # w1_ref : (D, F) bf16   b1_ref: (1, F) f32   w2_ref: (F, D) bf16   b2_ref: (1, D) f32
    # g*/be* : (1, D) f32 LayerNorm affine params
    # scratch: q3 (H,tq,hd) bf16; k3/v3 (num_kt,H,tk,hd) bf16 persistent per batch;
    #          m/l (H,tq,1) f32; acc (H,tq,hd) f32; attn (tq, D) f32
    f32 = jnp.float32
    bf16 = jnp.bfloat16

    tq, d_model = xq_ref.shape
    hd = d_model // heads
    num_kt, _, k_tile, _ = k3_ref.shape

    # --- K/V projection: ONE lane-dense matmul, once per batch (qi == 0), then
    #     persisted head-major in VMEM scratch across all query tiles of this batch.
    @pl.when(pl.program_id(1) == 0)
    def _fill_kv():
        kv = jnp.dot(xkv_ref[...], wkv_ref[...],
                     preferred_element_type=f32).astype(bf16)          # (S, 2D)
        for h in range(heads):
            k3_ref[:, h] = kv[:, h * hd:(h + 1) * hd].reshape(num_kt, k_tile, hd)
            v3_ref[:, h] = kv[:, d_model + h * hd:
                              d_model + (h + 1) * hd].reshape(num_kt, k_tile, hd)

    # --- Q projection: single lane-dense matmul (scale folded into Wq in wrapper).
    xq = xq_ref[...]
    q_flat = jnp.dot(xq.astype(bf16), wq_ref[...],
                     preferred_element_type=f32).astype(bf16)          # (tq, D)
    for h in range(heads):
        q3_ref[h] = q_flat[:, h * hd:(h + 1) * hd]
    q3 = q3_ref[...]                                                   # (H, tq, hd) bf16

    # --- flash-style online softmax over key tiles: VMEM stays O(tq * k_tile).
    m_ref[...] = jnp.full_like(m_ref, -jnp.inf)
    l_ref[...] = jnp.zeros_like(l_ref)
    acc_ref[...] = jnp.zeros_like(acc_ref)

    @pl.loop(0, num_kt)
    def _kv_step(kt):
        k_blk = k3_ref[kt]                                             # (H, tk, hd) bf16
        v_blk = v3_ref[kt]
        s = jnp.einsum('hqd,hkd->hqk', q3, k_blk,
                       preferred_element_type=f32)                     # (H, tq, tk) f32
        m_new = jnp.maximum(m_ref[...], jnp.max(s, axis=-1, keepdims=True))
        alpha = jnp.exp(m_ref[...] - m_new)                            # f32 elementwise (v5e)
        p = jnp.exp(s - m_new)
        l_ref[...] = alpha * l_ref[...] + jnp.sum(p, axis=-1, keepdims=True)
        acc_ref[...] = alpha * acc_ref[...] + jnp.einsum(
            'hqk,hkd->hqd', p.astype(bf16), v_blk, preferred_element_type=f32)
        m_ref[...] = m_new

    # --- fold softmax normalization after A@V (EUP reciprocal, off the VALU path).
    o3 = acc_ref[...] * pl.reciprocal(l_ref[...], approx=True)         # (H, tq, hd) f32

    # --- combine heads into a (tq, D) VMEM slab.
    for h in range(heads):
        attn_ref[:, h * hd:(h + 1) * hd] = o3[h]
    attn_out = attn_ref[...]

    # --- residual + LayerNorm 1 (f32)
    x1 = _layer_norm(attn_out + xq.astype(f32), g1_ref[...], be1_ref[...])

    # --- feed-forward: relu(x1 @ W1 + b1) @ W2 + b2   (dropout == identity)
    h1 = jnp.dot(x1.astype(bf16), w1_ref[...], preferred_element_type=f32) + b1_ref[...]
    h1 = jnp.maximum(h1, 0.0)
    ffn = jnp.dot(h1.astype(bf16), w2_ref[...], preferred_element_type=f32) + b2_ref[...]

    # --- residual + LayerNorm 2, single full-width HBM store.
    out_ref[...] = _layer_norm(x1 + ffn, g2_ref[...], be2_ref[...]).astype(out_ref.dtype)


_LADDER_Q = (1024, 512, 256, 128)
_LADDER_K = (512, 256, 128)


def _vmem_budget_bytes():
    """Per-generation VMEM capacity (v5e/v6e: 128 MiB; v7x: 64 MiB per core)."""
    try:
        return int(pltpu.get_tpu_info().vmem_capacity_bytes)
    except Exception:
        return 64 * 1024 * 1024  # conservative fallback (v7x-sized)


def _select_tiles(S, D, F, heads, x_itemsize, budget):
    """Pick (q_tile, k_tile) so the estimated per-step footprint fits the VMEM budget."""
    hd = D // heads

    def footprint(tq, tk):
        dbl = 2  # BlockSpec double-buffering
        blocks = dbl * (tq * D * x_itemsize + S * D * 2 + tq * D * x_itemsize)
        weights = dbl * 2 * (D * D + D * 2 * D + D * F + F * D)       # bf16 pages
        scratch = (heads * tq * hd * 2 + 2 * heads * S * hd * 2
                   + 2 * heads * tq * 4 + heads * tq * hd * 4 + tq * D * 4)
        live = 3 * heads * tq * tk * 4 + 2 * tq * F * 4               # scores/probs + FFN hidden
        return blocks + weights + scratch + live

    q_cands = [t for t in _LADDER_Q if S % t == 0] or [S]
    k_cands = [t for t in _LADDER_K if S % t == 0] or [S]
    for tq in q_cands:
        for tk in k_cands:
            if footprint(tq, tk) <= 0.7 * budget:
                return tq, tk
    return q_cands[-1], k_cands[-1]


def encoder_layer_forward(x, wq, wk, wv, w1, b1, w2, b2, g1, be1, g2, be2,
                          heads, *, q_tile=None, k_tile=None):
    """x: [B, S, D].  Weights in PyTorch layout: wq/wk/wv [D, D], w1 [F, D], w2 [D, F]."""
    B, S, D = x.shape
    assert D % heads == 0
    hd = D // heads
    F = w1.shape[0]

    budget = _vmem_budget_bytes()
    tq_auto, tk_auto = _select_tiles(S, D, F, heads, x.dtype.itemsize, budget)
    tq = q_tile or tq_auto
    tk = k_tile or tk_auto
    assert S % tq == 0 and S % tk == 0, "tiles must divide the sequence length"
    num_kt = S // tk

    bf16, f32 = jnp.bfloat16, jnp.float32

    # bf16 MXU operands; 1/sqrt(hd) folded into Wq; K|V fused, split at lane offset D.
    wq_t = (wq.T / math.sqrt(hd)).astype(bf16)                    # (D, D)
    wkv_t = jnp.concatenate([wk.T, wv.T], axis=1).astype(bf16)    # (D, 2D)
    w1_t = w1.T.astype(bf16)                                      # (D, F)
    w2_t = w2.T.astype(bf16)                                      # (F, D)
    b1r = b1.reshape(1, F).astype(f32)
    b2r = b2.reshape(1, D).astype(f32)
    g1r, be1r = g1.reshape(1, D).astype(f32), be1.reshape(1, D).astype(f32)
    g2r, be2r = g2.reshape(1, D).astype(f32), be2.reshape(1, D).astype(f32)
    x_kv = x.astype(bf16)                                         # K/V source stream only

    kernel = functools.partial(encoder_layer_kernel, heads=heads)

    grid_spec = pltpu.PrefetchScalarGridSpec(
        num_scalar_prefetch=0,
        grid=(B, S // tq),
        in_specs=[
            pl.BlockSpec((None, tq, D), lambda b, qi: (b, qi, 0)),   # x (query/residual tile)
            pl.BlockSpec((None, S, D), lambda b, qi: (b, 0, 0)),     # x bf16 (K/V source, per batch)
            pl.BlockSpec((D, D), lambda b, qi: (0, 0)),              # Wq^T (scaled, bf16)
            pl.BlockSpec((D, 2 * D), lambda b, qi: (0, 0)),          # [Wk^T | Wv^T] (bf16)
            pl.BlockSpec((D, F), lambda b, qi: (0, 0)),              # W1^T (bf16)
            pl.BlockSpec((1, F), lambda b, qi: (0, 0)),              # b1
            pl.BlockSpec((F, D), lambda b, qi: (0, 0)),              # W2^T (bf16)
            pl.BlockSpec((1, D), lambda b, qi: (0, 0)),              # b2
            pl.BlockSpec((1, D), lambda b, qi: (0, 0)),              # norm1 gamma
            pl.BlockSpec((1, D), lambda b, qi: (0, 0)),              # norm1 beta
            pl.BlockSpec((1, D), lambda b, qi: (0, 0)),              # norm2 gamma
            pl.BlockSpec((1, D), lambda b, qi: (0, 0)),              # norm2 beta
        ],
        out_specs=pl.BlockSpec((None, tq, D), lambda b, qi: (b, qi, 0)),
        scratch_shapes=[
            pltpu.VMEM((heads, tq, hd), bf16),            # Q, head-major
            pltpu.VMEM((num_kt, heads, tk, hd), bf16),    # K, persistent per batch
            pltpu.VMEM((num_kt, heads, tk, hd), bf16),    # V, persistent per batch
            pltpu.VMEM((heads, tq, 1), f32),              # online-softmax max
            pltpu.VMEM((heads, tq, 1), f32),              # online-softmax denom
            pltpu.VMEM((heads, tq, hd), f32),             # attention accumulator
            pltpu.VMEM((tq, D), f32),                     # combined-heads slab
        ],
    )

    flops = int(2 * B * S * D * D            # Q projection
                + 4 * B * S * D * D          # K/V projection
                + 4 * B * S * S * D          # QK^T + A@V
                + 4 * B * S * D * F)         # FFN
    transcendentals = int(B * heads * S * S + 4 * B * S)
    bytes_accessed = int(B * S * D * (2 * x.dtype.itemsize + 2)
                         + 2 * (3 * D * D + 2 * D * F))

    return pl.pallas_call(
        kernel,
        out_shape=jax.ShapeDtypeStruct((B, S, D), x.dtype),
        grid_spec=grid_spec,
        compiler_params=pltpu.CompilerParams(
            # batch: megacore-shardable; qi: "arbitrary" so the per-batch K/V
            # scratch filled at qi == 0 is valid for all later query tiles.
            dimension_semantics=("parallel", "arbitrary"),
            vmem_limit_bytes=int(budget * 0.9),
        ),
        cost_estimate=pl.CostEstimate(flops=flops,
                                      transcendentals=transcendentals,
                                      bytes_accessed=bytes_accessed),
    )(x, x_kv, wq_t, wkv_t, w1_t, b1r, w2_t, b2r, g1r, be1r, g2r, be2r)


def reference_encoder_layer(x, wq, wk, wv, w1, b1, w2, b2, g1, be1, g2, be2, heads):
    """Plain-JAX f32 reference mirroring the PyTorch EncoderLayer (inference mode)."""
    B, S, D = x.shape
    hd = D // heads
    q = x @ wq.T
    k = x @ wk.T
    v = x @ wv.T

    def split(t):
        return t.reshape(B, S, heads, hd).transpose(0, 2, 1, 3)

    qh, kh, vh = map(split, (q, k, v))
    w = jnp.einsum('bhqd,bhkd->bhqk', qh, kh) / math.sqrt(hd)
    a = jax.nn.softmax(w, axis=-1)
    o = jnp.einsum('bhqk,bhkd->bhqd', a, vh)
    o = o.transpose(0, 2, 1, 3).reshape(B, S, D)

    x1 = _layer_norm(o + x, g1, be1)
    ff = jax.nn.relu(x1 @ w1.T + b1)
    ff = ff @ w2.T + b2
    return _layer_norm(x1 + ff, g2, be2)


if __name__ == "__main__":
    B, S, D, H, P = 2, 8, 32, 4, 64   # batch, seq, d_model, heads, proj_forward

    key = jax.random.PRNGKey(0)
    keys = jax.random.split(key, 12)
    x = jax.random.normal(keys[0], (B, S, D), dtype=jnp.float32)

    def linear_w(k, out_dim, in_dim):
        bound = 1.0 / math.sqrt(in_dim)
        return jax.random.uniform(k, (out_dim, in_dim), jnp.float32, -bound, bound)

    wq = linear_w(keys[1], D, D)
    wk = linear_w(keys[2], D, D)
    wv = linear_w(keys[3], D, D)
    w1 = linear_w(keys[4], P, D)
    w2 = linear_w(keys[5], D, P)
    b1 = jax.random.uniform(keys[6], (P,), jnp.float32,
                            -1.0 / math.sqrt(D), 1.0 / math.sqrt(D))
    b2 = jax.random.uniform(keys[7], (D,), jnp.float32,
                            -1.0 / math.sqrt(P), 1.0 / math.sqrt(P))
    # LayerNorm affine params (randomized to exercise the math; torch default is ones/zeros).
    g1 = 1.0 + 0.1 * jax.random.normal(keys[8], (D,), jnp.float32)
    be1 = 0.1 * jax.random.normal(keys[9], (D,), jnp.float32)
    g2 = 1.0 + 0.1 * jax.random.normal(keys[10], (D,), jnp.float32)
    be2 = 0.1 * jax.random.normal(keys[11], (D,), jnp.float32)

    out = encoder_layer_forward(x, wq, wk, wv, w1, b1, w2, b2, g1, be1, g2, be2, H)
    out = jax.block_until_ready(out)

    ref = reference_encoder_layer(x, wq, wk, wv, w1, b1, w2, b2, g1, be1, g2, be2, H)
    assert out.shape == (B, S, D)
    err = float(jnp.max(jnp.abs(out - ref)))
    # bf16 MXU operands + approx reciprocal vs. an all-f32 reference => looser tolerance.
    assert err < 7.5e-2, f"max abs err vs reference: {err}"

    print("KERNEL_OK")
</pallas_src>

<mosaic_0001>
module attributes {stable_mosaic.version = 11 : i64} {
  func.func @encoder_layer_kernel(%arg0: i32, %arg1: i32, %arg2: memref<1x8x32xf32, #tpu.memory_space<vmem>>, %arg3: memref<1x8x32xbf16, #tpu.memory_space<vmem>>, %arg4: memref<32x32xbf16, #tpu.memory_space<vmem>>, %arg5: memref<32x64xbf16, #tpu.memory_space<vmem>>, %arg6: memref<32x64xbf16, #tpu.memory_space<vmem>>, %arg7: memref<1x64xf32, #tpu.memory_space<vmem>>, %arg8: memref<64x32xbf16, #tpu.memory_space<vmem>>, %arg9: memref<1x32xf32, #tpu.memory_space<vmem>>, %arg10: memref<1x32xf32, #tpu.memory_space<vmem>>, %arg11: memref<1x32xf32, #tpu.memory_space<vmem>>, %arg12: memref<1x32xf32, #tpu.memory_space<vmem>>, %arg13: memref<1x32xf32, #tpu.memory_space<vmem>>, %arg14: memref<1x8x32xf32, #tpu.memory_space<vmem>>, %arg15: memref<4x8x8xbf16, #tpu.memory_space<vmem>>, %arg16: memref<1x4x8x8xbf16, #tpu.memory_space<vmem>>, %arg17: memref<1x4x8x8xbf16, #tpu.memory_space<vmem>>, %arg18: memref<4x8x1xf32, #tpu.memory_space<vmem>>, %arg19: memref<4x8x1xf32, #tpu.memory_space<vmem>>, %arg20: memref<4x8x8xf32, #tpu.memory_space<vmem>>, %arg21: memref<8x32xf32, #tpu.memory_space<vmem>>) attributes {dimension_semantics = [#tpu.dimension_semantics<parallel>, #tpu.dimension_semantics<arbitrary>], iteration_bounds = array<i64: 2, 1>, scalar_prefetch = 0 : i64, scratch_operands = 7 : i64, tpu.core_type = #tpu.core_type<tc>, window_params = [{transform_indices = @transform_0, window_bounds = array<i64: 1, 8, 32>}, {transform_indices = @transform_1, window_bounds = array<i64: 1, 8, 32>}, {pipeline_mode = #tpu.pipeline_mode<synchronous>, transform_indices = @transform_2, window_bounds = array<i64: 32, 32>}, {pipeline_mode = #tpu.pipeline_mode<synchronous>, transform_indices = @transform_3, window_bounds = array<i64: 32, 64>}, {pipeline_mode = #tpu.pipeline_mode<synchronous>, transform_indices = @transform_4, window_bounds = array<i64: 32, 64>}, {pipeline_mode = #tpu.pipeline_mode<synchronous>, transform_indices = @transform_5, window_bounds = array<i64: 1, 64>}, {pipeline_mode = #tpu.pipeline_mode<synchronous>, transform_indices = @transform_6, window_bounds = array<i64: 64, 32>}, {pipeline_mode = #tpu.pipeline_mode<synchronous>, transform_indices = @transform_7, window_bounds = array<i64: 1, 32>}, {pipeline_mode = #tpu.pipeline_mode<synchronous>, transform_indices = @transform_8, window_bounds = array<i64: 1, 32>}, {pipeline_mode = #tpu.pipeline_mode<synchronous>, transform_indices = @transform_9, window_bounds = array<i64: 1, 32>}, {pipeline_mode = #tpu.pipeline_mode<synchronous>, transform_indices = @transform_10, window_bounds = array<i64: 1, 32>}, {pipeline_mode = #tpu.pipeline_mode<synchronous>, transform_indices = @transform_11, window_bounds = array<i64: 1, 32>}, {transform_indices = @transform_12, window_bounds = array<i64: 1, 8, 32>}]} {
    %c0_i32 = arith.constant 0 : i32
    %0 = arith.cmpi eq, %arg1, %c0_i32 : i32
    %1 = arith.extui %0 : i1 to i32
    %c0_i32_0 = arith.constant 0 : i32
    %2 = arith.cmpi ne, %1, %c0_i32_0 : i32
    scf.if %2 {
      %c0_108 = arith.constant 0 : index
      %c0_109 = arith.constant 0 : index
      %c0_110 = arith.constant 0 : index
      %146 = vector.load %arg3[%c0_108, %c0_109, %c0_110] : memref<1x8x32xbf16, #tpu.memory_space<vmem>>, vector<1x8x32xbf16>
      %147 = vector.shape_cast %146 : vector<1x8x32xbf16> to vector<8x32xbf16>
      %c0_111 = arith.constant 0 : index
      %c0_112 = arith.constant 0 : index
      %148 = vector.load %arg5[%c0_111, %c0_112] : memref<32x64xbf16, #tpu.memory_space<vmem>>, vector<32x64xbf16>
      %cst_113 = arith.constant dense<0.000000e+00> : vector<8x64xf32>
      %149 = tpu.matmul %147, %148, %cst_113 {dimension_numbers = #tpu.dot_dimension_numbers<[1], [0], [0], [1], [0, 0, 1, 1], [], []>} : vector<8x32xbf16>, vector<32x64xbf16>, vector<8x64xf32> -> vector<8x64xf32>
      %150 = arith.truncf %149 : vector<8x64xf32> to vector<8x64xbf16>
      %151 = vector.extract_strided_slice %150 {offsets = [0, 0], sizes = [8, 8], strides = [1, 1]} : vector<8x64xbf16> to vector<8x8xbf16>
      %152 = vector.shape_cast %151 : vector<8x8xbf16> to vector<1x8x8xbf16>
      %c0_114 = arith.constant 0 : index
      %c0_115 = arith.constant 0 : index
      %c0_116 = arith.constant 0 : index
      %c0_117 = arith.constant 0 : index
      %153 = vector.load %arg16[%c0_114, %c0_115, %c0_116, %c0_117] : memref<1x4x8x8xbf16, #tpu.memory_space<vmem>>, vector<1x1x8x8xbf16>
      %154 = vector.shape_cast %153 : vector<1x1x8x8xbf16> to vector<1x8x8xbf16>
      %155 = vector.shape_cast %152 : vector<1x8x8xbf16> to vector<1x1x8x8xbf16>
      tpu.vector_store %arg16[%c0_114, %c0_115, %c0_116, %c0_117], %155 {strides = array<i32>} : memref<1x4x8x8xbf16, #tpu.memory_space<vmem>>, vector<1x1x8x8xbf16>,
      %156 = vector.extract_strided_slice %150 {offsets = [0, 32], sizes = [8, 8], strides = [1, 1]} : vector<8x64xbf16> to vector<8x8xbf16>
      %157 = vector.shape_cast %156 : vector<8x8xbf16> to vector<1x8x8xbf16>
      %c0_118 = arith.constant 0 : index
      %c0_119 = arith.constant 0 : index
      %c0_120 = arith.constant 0 : index
      %c0_121 = arith.constant 0 : index
      %158 = vector.load %arg17[%c0_118, %c0_119, %c0_120, %c0_121] : memref<1x4x8x8xbf16, #tpu.memory_space<vmem>>, vector<1x1x8x8xbf16>
      %159 = vector.shape_cast %158 : vector<1x1x8x8xbf16> to vector<1x8x8xbf16>
      %160 = vector.shape_cast %157 : vector<1x8x8xbf16> to vector<1x1x8x8xbf16>
      tpu.vector_store %arg17[%c0_118, %c0_119, %c0_120, %c0_121], %160 {strides = array<i32>} : memref<1x4x8x8xbf16, #tpu.memory_space<vmem>>, vector<1x1x8x8xbf16>,
      %161 = vector.extract_strided_slice %150 {offsets = [0, 8], sizes = [8, 8], strides = [1, 1]} : vector<8x64xbf16> to vector<8x8xbf16>
      %162 = vector.shape_cast %161 : vector<8x8xbf16> to vector<1x8x8xbf16>
      %c0_122 = arith.constant 0 : index
      %c1_123 = arith.constant 1 : index
      %c0_124 = arith.constant 0 : index
      %c0_125 = arith.constant 0 : index
      %163 = vector.load %arg16[%c0_122, %c1_123, %c0_124, %c0_125] : memref<1x4x8x8xbf16, #tpu.memory_space<vmem>>, vector<1x1x8x8xbf16>
      %164 = vector.shape_cast %163 : vector<1x1x8x8xbf16> to vector<1x8x8xbf16>
      %165 = vector.shape_cast %162 : vector<1x8x8xbf16> to vector<1x1x8x8xbf16>
      tpu.vector_store %arg16[%c0_122, %c1_123, %c0_124, %c0_125], %165 {strides = array<i32>} : memref<1x4x8x8xbf16, #tpu.memory_space<vmem>>, vector<1x1x8x8xbf16>,
      %166 = vector.extract_strided_slice %150 {offsets = [0, 40], sizes = [8, 8], strides = [1, 1]} : vector<8x64xbf16> to vector<8x8xbf16>
      %167 = vector.shape_cast %166 : vector<8x8xbf16> to vector<1x8x8xbf16>
      %c0_126 = arith.constant 0 : index
      %c1_127 = arith.constant 1 : index
      %c0_128 = arith.constant 0 : index
      %c0_129 = arith.constant 0 : index
      %168 = vector.load %arg17[%c0_126, %c1_127, %c0_128, %c0_129] : memref<1x4x8x8xbf16, #tpu.memory_space<vmem>>, vector<1x1x8x8xbf16>
      %169 = vector.shape_cast %168 : vector<1x1x8x8xbf16> to vector<1x8x8xbf16>
      %170 = vector.shape_cast %167 : vector<1x8x8xbf16> to vector<1x1x8x8xbf16>
      tpu.vector_store %arg17[%c0_126, %c1_127, %c0_128, %c0_129], %170 {strides = array<i32>} : memref<1x4x8x8xbf16, #tpu.memory_space<vmem>>, vector<1x1x8x8xbf16>,
      %171 = vector.extract_strided_slice %150 {offsets = [0, 16], sizes = [8, 8], strides = [1, 1]} : vector<8x64xbf16> to vector<8x8xbf16>
      %172 = vector.shape_cast %171 : vector<8x8xbf16> to vector<1x8x8xbf16>
      %c0_130 = arith.constant 0 : index
      %c2_131 = arith.constant 2 : index
      %c0_132 = arith.constant 0 : index
      %c0_133 = arith.constant 0 : index
      %173 = vector.load %arg16[%c0_130, %c2_131, %c0_132, %c0_133] : memref<1x4x8x8xbf16, #tpu.memory_space<vmem>>, vector<1x1x8x8xbf16>
      %174 = vector.shape_cast %173 : vector<1x1x8x8xbf16> to vector<1x8x8xbf16>
      %175 = vector.shape_cast %172 : vector<1x8x8xbf16> to vector<1x1x8x8xbf16>
      tpu.vector_store %arg16[%c0_130, %c2_131, %c0_132, %c0_133], %175 {strides = array<i32>} : memref<1x4x8x8xbf16, #tpu.memory_space<vmem>>, vector<1x1x8x8xbf16>,
      %176 = vector.extract_strided_slice %150 {offsets = [0, 48], sizes = [8, 8], strides = [1, 1]} : vector<8x64xbf16> to vector<8x8xbf16>
      %177 = vector.shape_cast %176 : vector<8x8xbf16> to vector<1x8x8xbf16>
      %c0_134 = arith.constant 0 : index
      %c2_135 = arith.constant 2 : index
      %c0_136 = arith.constant 0 : index
      %c0_137 = arith.constant 0 : index
      %178 = vector.load %arg17[%c0_134, %c2_135, %c0_136, %c0_137] : memref<1x4x8x8xbf16, #tpu.memory_space<vmem>>, vector<1x1x8x8xbf16>
      %179 = vector.shape_cast %178 : vector<1x1x8x8xbf16> to vector<1x8x8xbf16>
      %180 = vector.shape_cast %177 : vector<1x8x8xbf16> to vector<1x1x8x8xbf16>
      tpu.vector_store %arg17[%c0_134, %c2_135, %c0_136, %c0_137], %180 {strides = array<i32>} : memref<1x4x8x8xbf16, #tpu.memory_space<vmem>>, vector<1x1x8x8xbf16>,
      %181 = vector.extract_strided_slice %150 {offsets = [0, 24], sizes = [8, 8], strides = [1, 1]} : vector<8x64xbf16> to vector<8x8xbf16>
      %182 = vector.shape_cast %181 : vector<8x8xbf16> to vector<1x8x8xbf16>
      %c0_138 = arith.constant 0 : index
      %c3_139 = arith.constant 3 : index
      %c0_140 = arith.constant 0 : index
      %c0_141 = arith.constant 0 : index
      %183 = vector.load %arg16[%c0_138, %c3_139, %c0_140, %c0_141] : memref<1x4x8x8xbf16, #tpu.memory_space<vmem>>, vector<1x1x8x8xbf16>
      %184 = vector.shape_cast %183 : vector<1x1x8x8xbf16> to vector<1x8x8xbf16>
      %185 = vector.shape_cast %182 : vector<1x8x8xbf16> to vector<1x1x8x8xbf16>
      tpu.vector_store %arg16[%c0_138, %c3_139, %c0_140, %c0_141], %185 {strides = array<i32>} : memref<1x4x8x8xbf16, #tpu.memory_space<vmem>>, vector<1x1x8x8xbf16>,
      %186 = vector.extract_strided_slice %150 {offsets = [0, 56], sizes = [8, 8], strides = [1, 1]} : vector<8x64xbf16> to vector<8x8xbf16>
      %187 = vector.shape_cast %186 : vector<8x8xbf16> to vector<1x8x8xbf16>
      %c0_142 = arith.constant 0 : index
      %c3_143 = arith.constant 3 : index
      %c0_144 = arith.constant 0 : index
      %c0_145 = arith.constant 0 : index
      %188 = vector.load %arg17[%c0_142, %c3_143, %c0_144, %c0_145] : memref<1x4x8x8xbf16, #tpu.memory_space<vmem>>, vector<1x1x8x8xbf16>
      %189 = vector.shape_cast %188 : vector<1x1x8x8xbf16> to vector<1x8x8xbf16>
      %190 = vector.shape_cast %187 : vector<1x8x8xbf16> to vector<1x1x8x8xbf16>
      tpu.vector_store %arg17[%c0_142, %c3_143, %c0_144, %c0_145], %190 {strides = array<i32>} : memref<1x4x8x8xbf16, #tpu.memory_space<vmem>>, vector<1x1x8x8xbf16>,
    } else {
    }
    %c0 = arith.constant 0 : index
    %c0_1 = arith.constant 0 : index
    %c0_2 = arith.constant 0 : index
    %3 = vector.load %arg2[%c0, %c0_1, %c0_2] : memref<1x8x32xf32, #tpu.memory_space<vmem>>, vector<1x8x32xf32>
    %4 = vector.shape_cast %3 : vector<1x8x32xf32> to vector<8x32xf32>
    %5 = arith.truncf %4 : vector<8x32xf32> to vector<8x32xbf16>
    %c0_3 = arith.constant 0 : index
    %c0_4 = arith.constant 0 : index
    %6 = vector.load %arg4[%c0_3, %c0_4] : memref<32x32xbf16, #tpu.memory_space<vmem>>, vector<32x32xbf16>
    %cst = arith.constant dense<0.000000e+00> : vector<8x32xf32>
    %7 = tpu.matmul %5, %6, %cst {dimension_numbers = #tpu.dot_dimension_numbers<[1], [0], [0], [1], [0, 0, 1, 1], [], []>} : vector<8x32xbf16>, vector<32x32xbf16>, vector<8x32xf32> -> vector<8x32xf32>
    %8 = arith.truncf %7 : vector<8x32xf32> to vector<8x32xbf16>
    %9 = vector.extract_strided_slice %8 {offsets = [0, 0], sizes = [8, 8], strides = [1, 1]} : vector<8x32xbf16> to vector<8x8xbf16>
    %c0_5 = arith.constant 0 : index
    %c0_6 = arith.constant 0 : index
    %c0_7 = arith.constant 0 : index
    %10 = vector.load %arg15[%c0_5, %c0_6, %c0_7] : memref<4x8x8xbf16, #tpu.memory_space<vmem>>, vector<1x8x8xbf16>
    %11 = vector.shape_cast %10 : vector<1x8x8xbf16> to vector<8x8xbf16>
    %12 = vector.shape_cast %9 : vector<8x8xbf16> to vector<1x8x8xbf16>
    tpu.vector_store %arg15[%c0_5, %c0_6, %c0_7], %12 {strides = array<i32>} : memref<4x8x8xbf16, #tpu.memory_space<vmem>>, vector<1x8x8xbf16>,
    %13 = vector.extract_strided_slice %8 {offsets = [0, 8], sizes = [8, 8], strides = [1, 1]} : vector<8x32xbf16> to vector<8x8xbf16>
    %c1 = arith.constant 1 : index
    %c0_8 = arith.constant 0 : index
    %c0_9 = arith.constant 0 : index
    %14 = vector.load %arg15[%c1, %c0_8, %c0_9] : memref<4x8x8xbf16, #tpu.memory_space<vmem>>, vector<1x8x8xbf16>
    %15 = vector.shape_cast %14 : vector<1x8x8xbf16> to vector<8x8xbf16>
    %16 = vector.shape_cast %13 : vector<8x8xbf16> to vector<1x8x8xbf16>
    tpu.vector_store %arg15[%c1, %c0_8, %c0_9], %16 {strides = array<i32>} : memref<4x8x8xbf16, #tpu.memory_space<vmem>>, vector<1x8x8xbf16>,
    %17 = vector.extract_strided_slice %8 {offsets = [0, 16], sizes = [8, 8], strides = [1, 1]} : vector<8x32xbf16> to vector<8x8xbf16>
    %c2 = arith.constant 2 : index
    %c0_10 = arith.constant 0 : index
    %c0_11 = arith.constant 0 : index
    %18 = vector.load %arg15[%c2, %c0_10, %c0_11] : memref<4x8x8xbf16, #tpu.memory_space<vmem>>, vector<1x8x8xbf16>
    %19 = vector.shape_cast %18 : vector<1x8x8xbf16> to vector<8x8xbf16>
    %20 = vector.shape_cast %17 : vector<8x8xbf16> to vector<1x8x8xbf16>
    tpu.vector_store %arg15[%c2, %c0_10, %c0_11], %20 {strides = array<i32>} : memref<4x8x8xbf16, #tpu.memory_space<vmem>>, vector<1x8x8xbf16>,
    %21 = vector.extract_strided_slice %8 {offsets = [0, 24], sizes = [8, 8], strides = [1, 1]} : vector<8x32xbf16> to vector<8x8xbf16>
    %c3 = arith.constant 3 : index
    %c0_12 = arith.constant 0 : index
    %c0_13 = arith.constant 0 : index
    %22 = vector.load %arg15[%c3, %c0_12, %c0_13] : memref<4x8x8xbf16, #tpu.memory_space<vmem>>, vector<1x8x8xbf16>
    %23 = vector.shape_cast %22 : vector<1x8x8xbf16> to vector<8x8xbf16>
    %24 = vector.shape_cast %21 : vector<8x8xbf16> to vector<1x8x8xbf16>
    tpu.vector_store %arg15[%c3, %c0_12, %c0_13], %24 {strides = array<i32>} : memref<4x8x8xbf16, #tpu.memory_space<vmem>>, vector<1x8x8xbf16>,
    %c0_14 = arith.constant 0 : index
    %c0_15 = arith.constant 0 : index
    %c0_16 = arith.constant 0 : index
    %25 = vector.load %arg15[%c0_14, %c0_15, %c0_16] : memref<4x8x8xbf16, #tpu.memory_space<vmem>>, vector<4x8x8xbf16>
    %cst_17 = arith.constant 0xFF800000 : f32
    %26 = vector.broadcast %cst_17 : f32 to vector<4x8x1xf32>
    %c0_18 = arith.constant 0 : index
    %c0_19 = arith.constant 0 : index
    %c0_20 = arith.constant 0 : index
    %27 = vector.load %arg18[%c0_18, %c0_19, %c0_20] : memref<4x8x1xf32, #tpu.memory_space<vmem>>, vector<4x8x1xf32>
    tpu.vector_store %arg18[%c0_18, %c0_19, %c0_20], %26 {strides = array<i32>} : memref<4x8x1xf32, #tpu.memory_space<vmem>>, vector<4x8x1xf32>,
    %cst_21 = arith.constant 0.000000e+00 : f32
    %28 = vector.broadcast %cst_21 : f32 to vector<4x8x1xf32>
    %c0_22 = arith.constant 0 : index
    %c0_23 = arith.constant 0 : index
    %c0_24 = arith.constant 0 : index
    %29 = vector.load %arg19[%c0_22, %c0_23, %c0_24] : memref<4x8x1xf32, #tpu.memory_space<vmem>>, vector<4x8x1xf32>
    tpu.vector_store %arg19[%c0_22, %c0_23, %c0_24], %28 {strides = array<i32>} : memref<4x8x1xf32, #tpu.memory_space<vmem>>, vector<4x8x1xf32>,
    %cst_25 = arith.constant 0.000000e+00 : f32
    %30 = vector.broadcast %cst_25 : f32 to vector<4x8x8xf32>
    %c0_26 = arith.constant 0 : index
    %c0_27 = arith.constant 0 : index
    %c0_28 = arith.constant 0 : index
    %31 = vector.load %arg20[%c0_26, %c0_27, %c0_28] : memref<4x8x8xf32, #tpu.memory_space<vmem>>, vector<4x8x8xf32>
    tpu.vector_store %arg20[%c0_26, %c0_27, %c0_28], %30 {strides = array<i32>} : memref<4x8x8xf32, #tpu.memory_space<vmem>>, vector<4x8x8xf32>,
    %c0_i32_29 = arith.constant 0 : i32
    %c1_i32 = arith.constant 1 : i32
    %32 = arith.muli %c0_i32_29, %c1_i32 : i32
    %c0_i32_30 = arith.constant 0 : i32
    %33 = arith.addi %c0_i32_30, %32 : i32
    %34 = arith.index_cast %33 : i32 to index
    %c0_31 = arith.constant 0 : index
    %c0_32 = arith.constant 0 : index
    %c0_33 = arith.constant 0 : index
    %35 = vector.load %arg16[%34, %c0_31, %c0_32, %c0_33] : memref<1x4x8x8xbf16, #tpu.memory_space<vmem>>, vector<1x4x8x8xbf16>
    %36 = vector.shape_cast %35 : vector<1x4x8x8xbf16> to vector<4x8x8xbf16>
    %37 = arith.index_cast %33 : i32 to index
    %c0_34 = arith.constant 0 : index
    %c0_35 = arith.constant 0 : index
    %c0_36 = arith.constant 0 : index
    %38 = vector.load %arg17[%37, %c0_34, %c0_35, %c0_36] : memref<1x4x8x8xbf16, #tpu.memory_space<vmem>>, vector<1x4x8x8xbf16>
    %39 = vector.shape_cast %38 : vector<1x4x8x8xbf16> to vector<4x8x8xbf16>
    "tpu.trace_start"() <{level = 10 : i32, message = "hqd,hkd->hqk"}> : () -> ()
    %cst_37 = arith.constant dense<0.000000e+00> : vector<4x8x8xf32>
    %40 = tpu.matmul %25, %36, %cst_37 {dimension_numbers = #tpu.dot_dimension_numbers<[2], [2], [1], [1], [0, 0, 0, 1, 1, 1], [0], [0]>} : vector<4x8x8xbf16>, vector<4x8x8xbf16>, vector<4x8x8xf32> -> vector<4x8x8xf32>
    "tpu.trace_stop"() : () -> ()
    %c0_38 = arith.constant 0 : index
    %c0_39 = arith.constant 0 : index
    %c0_40 = arith.constant 0 : index
    %41 = vector.load %arg18[%c0_38, %c0_39, %c0_40] : memref<4x8x1xf32, #tpu.memory_space<vmem>>, vector<4x8x1xf32>
    %cst_41 = arith.constant dense<0xFF800000> : vector<4x8xf32>
    %42 = vector.multi_reduction <maximumf>, %40, %cst_41 [2] : vector<4x8x8xf32> to vector<4x8xf32>
    %43 = vector.shape_cast %42 : vector<4x8xf32> to vector<4x8x1xf32>
    %44 = arith.maximumf %41, %43 : vector<4x8x1xf32>
    %c0_42 = arith.constant 0 : index
    %c0_43 = arith.constant 0 : index
    %c0_44 = arith.constant 0 : index
    %45 = vector.load %arg18[%c0_42, %c0_43, %c0_44] : memref<4x8x1xf32, #tpu.memory_space<vmem>>, vector<4x8x1xf32>
    %46 = arith.subf %45, %44 : vector<4x8x1xf32>
    %47 = math.exp %46 : vector<4x8x1xf32>
    %48 = vector.broadcast %44 : vector<4x8x1xf32> to vector<4x8x8xf32>
    %49 = arith.subf %40, %48 : vector<4x8x8xf32>
    %50 = math.exp %49 : vector<4x8x8xf32>
    %c0_45 = arith.constant 0 : index
    %c0_46 = arith.constant 0 : index
    %c0_47 = arith.constant 0 : index
    %51 = vector.load %arg19[%c0_45, %c0_46, %c0_47] : memref<4x8x1xf32, #tpu.memory_space<vmem>>, vector<4x8x1xf32>
    %52 = arith.mulf %47, %51 : vector<4x8x1xf32>
    %cst_48 = arith.constant dense<0.000000e+00> : vector<4x8xf32>
    %53 = vector.multi_reduction <add>, %50, %cst_48 [2] : vector<4x8x8xf32> to vector<4x8xf32>
    %54 = vector.shape_cast %53 : vector<4x8xf32> to vector<4x8x1xf32>
    %55 = arith.addf %52, %54 : vector<4x8x1xf32>
    %c0_49 = arith.constant 0 : index
    %c0_50 = arith.constant 0 : index
    %c0_51 = arith.constant 0 : index
    %56 = vector.load %arg19[%c0_49, %c0_50, %c0_51] : memref<4x8x1xf32, #tpu.memory_space<vmem>>, vector<4x8x1xf32>
    tpu.vector_store %arg19[%c0_49, %c0_50, %c0_51], %55 {strides = array<i32>} : memref<4x8x1xf32, #tpu.memory_space<vmem>>, vector<4x8x1xf32>,
    %c0_52 = arith.constant 0 : index
    %c0_53 = arith.constant 0 : index
    %c0_54 = arith.constant 0 : index
    %57 = vector.load %arg20[%c0_52, %c0_53, %c0_54] : memref<4x8x8xf32, #tpu.memory_space<vmem>>, vector<4x8x8xf32>
    %58 = vector.broadcast %47 : vector<4x8x1xf32> to vector<4x8x8xf32>
    %59 = arith.mulf %58, %57 : vector<4x8x8xf32>
    %60 = arith.truncf %50 : vector<4x8x8xf32> to vector<4x8x8xbf16>
    "tpu.trace_start"() <{level = 10 : i32, message = "hqk,hkd->hqd"}> : () -> ()
    %cst_55 = arith.constant dense<0.000000e+00> : vector<4x8x8xf32>
    %61 = tpu.matmul %60, %39, %cst_55 {dimension_numbers = #tpu.dot_dimension_numbers<[2], [1], [1], [2], [0, 0, 0, 1, 1, 2], [0], [0]>} : vector<4x8x8xbf16>, vector<4x8x8xbf16>, vector<4x8x8xf32> -> vector<4x8x8xf32>
    "tpu.trace_stop"() : () -> ()
    %62 = arith.addf %59, %61 : vector<4x8x8xf32>
    %c0_56 = arith.constant 0 : index
    %c0_57 = arith.constant 0 : index
    %c0_58 = arith.constant 0 : index
    %63 = vector.load %arg20[%c0_56, %c0_57, %c0_58] : memref<4x8x8xf32, #tpu.memory_space<vmem>>, vector<4x8x8xf32>
    tpu.vector_store %arg20[%c0_56, %c0_57, %c0_58], %62 {strides = array<i32>} : memref<4x8x8xf32, #tpu.memory_space<vmem>>, vector<4x8x8xf32>,
    %c0_59 = arith.constant 0 : index
    %c0_60 = arith.constant 0 : index
    %c0_61 = arith.constant 0 : index
    %64 = vector.load %arg18[%c0_59, %c0_60, %c0_61] : memref<4x8x1xf32, #tpu.memory_space<vmem>>, vector<4x8x1xf32>
    tpu.vector_store %arg18[%c0_59, %c0_60, %c0_61], %44 {strides = array<i32>} : memref<4x8x1xf32, #tpu.memory_space<vmem>>, vector<4x8x1xf32>,
    %c1_i32_62 = arith.constant 1 : i32
    %c0_63 = arith.constant 0 : index
    %c0_64 = arith.constant 0 : index
    %c0_65 = arith.constant 0 : index
    %65 = vector.load %arg20[%c0_63, %c0_64, %c0_65] : memref<4x8x8xf32, #tpu.memory_space<vmem>>, vector<4x8x8xf32>
    %c0_66 = arith.constant 0 : index
    %c0_67 = arith.constant 0 : index
    %c0_68 = arith.constant 0 : index
    %66 = vector.load %arg19[%c0_66, %c0_67, %c0_68] : memref<4x8x1xf32, #tpu.memory_space<vmem>>, vector<4x8x1xf32>
    %67 = tpu.reciprocal %66 {approx = true} : vector<4x8x1xf32> -> vector<4x8x1xf32>
    %68 = vector.broadcast %67 : vector<4x8x1xf32> to vector<4x8x8xf32>
    %69 = arith.mulf %65, %68 : vector<4x8x8xf32>
    %70 = vector.extract_strided_slice %69 {offsets = [0, 0, 0], sizes = [1, 8, 8], strides = [1, 1, 1]} : vector<4x8x8xf32> to vector<1x8x8xf32>
    %71 = vector.shape_cast %70 : vector<1x8x8xf32> to vector<8x8xf32>
    %c0_69 = arith.constant 0 : index
    %c0_70 = arith.constant 0 : index
    %72 = vector.load %arg21[%c0_69, %c0_70] : memref<8x32xf32, #tpu.memory_space<vmem>>, vector<8x8xf32>
    tpu.vector_store %arg21[%c0_69, %c0_70], %71 {strides = array<i32>} : memref<8x32xf32, #tpu.memory_space<vmem>>, vector<8x8xf32>,
    %73 = vector.extract_strided_slice %69 {offsets = [1, 0, 0], sizes = [1, 8, 8], strides = [1, 1, 1]} : vector<4x8x8xf32> to vector<1x8x8xf32>
    %74 = vector.shape_cast %73 : vector<1x8x8xf32> to vector<8x8xf32>
    %c0_71 = arith.constant 0 : index
    %c8 = arith.constant 8 : index
    %75 = vector.load %arg21[%c0_71, %c8] : memref<8x32xf32, #tpu.memory_space<vmem>>, vector<8x8xf32>
    tpu.vector_store %arg21[%c0_71, %c8], %74 {strides = array<i32>} : memref<8x32xf32, #tpu.memory_space<vmem>>, vector<8x8xf32>,
    %76 = vector.extract_strided_slice %69 {offsets = [2, 0, 0], sizes = [1, 8, 8], strides = [1, 1, 1]} : vector<4x8x8xf32> to vector<1x8x8xf32>
    %77 = vector.shape_cast %76 : vector<1x8x8xf32> to vector<8x8xf32>
    %c0_72 = arith.constant 0 : index
    %c16 = arith.constant 16 : index
    %78 = vector.load %arg21[%c0_72, %c16] : memref<8x32xf32, #tpu.memory_space<vmem>>, vector<8x8xf32>
    tpu.vector_store %arg21[%c0_72, %c16], %77 {strides = array<i32>} : memref<8x32xf32, #tpu.memory_space<vmem>>, vector<8x8xf32>,
    %79 = vector.extract_strided_slice %69 {offsets = [3, 0, 0], sizes = [1, 8, 8], strides = [1, 1, 1]} : vector<4x8x8xf32> to vector<1x8x8xf32>
    %80 = vector.shape_cast %79 : vector<1x8x8xf32> to vector<8x8xf32>
    %c0_73 = arith.constant 0 : index
    %c24 = arith.constant 24 : index
    %81 = vector.load %arg21[%c0_73, %c24] : memref<8x32xf32, #tpu.memory_space<vmem>>, vector<8x8xf32>
    tpu.vector_store %arg21[%c0_73, %c24], %80 {strides = array<i32>} : memref<8x32xf32, #tpu.memory_space<vmem>>, vector<8x8xf32>,
    %c0_74 = arith.constant 0 : index
    %c0_75 = arith.constant 0 : index
    %82 = vector.load %arg21[%c0_74, %c0_75] : memref<8x32xf32, #tpu.memory_space<vmem>>, vector<8x32xf32>
    %83 = arith.addf %82, %4 : vector<8x32xf32>
    %c0_76 = arith.constant 0 : index
    %c0_77 = arith.constant 0 : index
    %84 = vector.load %arg10[%c0_76, %c0_77] : memref<1x32xf32, #tpu.memory_space<vmem>>, vector<1x32xf32>
    %c0_78 = arith.constant 0 : index
    %c0_79 = arith.constant 0 : index
    %85 = vector.load %arg11[%c0_78, %c0_79] : memref<1x32xf32, #tpu.memory_space<vmem>>, vector<1x32xf32>
    %cst_80 = arith.constant dense<0.000000e+00> : vector<8xf32>
    %86 = vector.multi_reduction <add>, %83, %cst_80 [1] : vector<8x32xf32> to vector<8xf32>
    %87 = vector.shape_cast %86 : vector<8xf32> to vector<8x1xf32>
    %cst_81 = arith.constant 3.200000e+01 : f32
    %88 = vector.broadcast %cst_81 : f32 to vector<8x1xf32>
    %89 = arith.divf %87, %88 : vector<8x1xf32>
    %90 = vector.broadcast %89 : vector<8x1xf32> to vector<8x32xf32>
    %91 = arith.subf %83, %90 : vector<8x32xf32>
    %92 = arith.mulf %91, %91 : vector<8x32xf32>
    %cst_82 = arith.constant dense<0.000000e+00> : vector<8xf32>
    %93 = vector.multi_reduction <add>, %92, %cst_82 [1] : vector<8x32xf32> to vector<8xf32>
    %94 = vector.shape_cast %93 : vector<8xf32> to vector<8x1xf32>
    %cst_83 = arith.constant 3.200000e+01 : f32
    %95 = vector.broadcast %cst_83 : f32 to vector<8x1xf32>
    %96 = arith.divf %94, %95 : vector<8x1xf32>
    %cst_84 = arith.constant 9.99999974E-6 : f32
    %97 = vector.broadcast %cst_84 : f32 to vector<8x1xf32>
    %98 = arith.addf %96, %97 : vector<8x1xf32>
    %99 = math.rsqrt %98 : vector<8x1xf32>
    %100 = vector.broadcast %99 : vector<8x1xf32> to vector<8x32xf32>
    %101 = arith.mulf %91, %100 : vector<8x32xf32>
    %102 = vector.broadcast %84 : vector<1x32xf32> to vector<8x32xf32>
    %103 = arith.mulf %101, %102 : vector<8x32xf32>
    %104 = vector.broadcast %85 : vector<1x32xf32> to vector<8x32xf32>
    %105 = arith.addf %103, %104 : vector<8x32xf32>
    %106 = arith.truncf %105 : vector<8x32xf32> to vector<8x32xbf16>
    %c0_85 = arith.constant 0 : index
    %c0_86 = arith.constant 0 : index
    %107 = vector.load %arg6[%c0_85, %c0_86] : memref<32x64xbf16, #tpu.memory_space<vmem>>, vector<32x64xbf16>
    %cst_87 = arith.constant dense<0.000000e+00> : vector<8x64xf32>
    %108 = tpu.matmul %106, %107, %cst_87 {dimension_numbers = #tpu.dot_dimension_numbers<[1], [0], [0], [1], [0, 0, 1, 1], [], []>} : vector<8x32xbf16>, vector<32x64xbf16>, vector<8x64xf32> -> vector<8x64xf32>
    %c0_88 = arith.constant 0 : index
    %c0_89 = arith.constant 0 : index
    %109 = vector.load %arg7[%c0_88, %c0_89] : memref<1x64xf32, #tpu.memory_space<vmem>>, vector<1x64xf32>
    %110 = vector.broadcast %109 : vector<1x64xf32> to vector<8x64xf32>
    %111 = arith.addf %108, %110 : vector<8x64xf32>
    %cst_90 = arith.constant 0.000000e+00 : f32
    %112 = vector.broadcast %cst_90 : f32 to vector<8x64xf32>
    %113 = arith.maximumf %111, %112 : vector<8x64xf32>
    %114 = arith.truncf %113 : vector<8x64xf32> to vector<8x64xbf16>
    %c0_91 = arith.constant 0 : index
    %c0_92 = arith.constant 0 : index
    %115 = vector.load %arg8[%c0_91, %c0_92] : memref<64x32xbf16, #tpu.memory_space<vmem>>, vector<64x32xbf16>
    %cst_93 = arith.constant dense<0.000000e+00> : vector<8x32xf32>
    %116 = tpu.matmul %114, %115, %cst_93 {dimension_numbers = #tpu.dot_dimension_numbers<[1], [0], [0], [1], [0, 0, 1, 1], [], []>} : vector<8x64xbf16>, vector<64x32xbf16>, vector<8x32xf32> -> vector<8x32xf32>
    %c0_94 = arith.constant 0 : index
    %c0_95 = arith.constant 0 : index
    %117 = vector.load %arg9[%c0_94, %c0_95] : memref<1x32xf32, #tpu.memory_space<vmem>>, vector<1x32xf32>
    %118 = vector.broadcast %117 : vector<1x32xf32> to vector<8x32xf32>
    %119 = arith.addf %116, %118 : vector<8x32xf32>
    %120 = arith.addf %105, %119 : vector<8x32xf32>
    %c0_96 = arith.constant 0 : index
    %c0_97 = arith.constant 0 : index
    %121 = vector.load %arg12[%c0_96, %c0_97] : memref<1x32xf32, #tpu.memory_space<vmem>>, vector<1x32xf32>
    %c0_98 = arith.constant 0 : index
    %c0_99 = arith.constant 0 : index
    %122 = vector.load %arg13[%c0_98, %c0_99] : memref<1x32xf32, #tpu.memory_space<vmem>>, vector<1x32xf32>
    %cst_100 = arith.constant dense<0.000000e+00> : vector<8xf32>
    %123 = vector.multi_reduction <add>, %120, %cst_100 [1] : vector<8x32xf32> to vector<8xf32>
    %124 = vector.shape_cast %123 : vector<8xf32> to vector<8x1xf32>
    %cst_101 = arith.constant 3.200000e+01 : f32
    %125 = vector.broadcast %cst_101 : f32 to vector<8x1xf32>
    %126 = arith.divf %124, %125 : vector<8x1xf32>
    %127 = vector.broadcast %126 : vector<8x1xf32> to vector<8x32xf32>
    %128 = arith.subf %120, %127 : vector<8x32xf32>
    %129 = arith.mulf %128, %128 : vector<8x32xf32>
    %cst_102 = arith.constant dense<0.000000e+00> : vector<8xf32>
    %130 = vector.multi_reduction <add>, %129, %cst_102 [1] : vector<8x32xf32> to vector<8xf32>
    %131 = vector.shape_cast %130 : vector<8xf32> to vector<8x1xf32>
    %cst_103 = arith.constant 3.200000e+01 : f32
    %132 = vector.broadcast %cst_103 : f32 to vector<8x1xf32>
    %133 = arith.divf %131, %132 : vector<8x1xf32>
    %cst_104 = arith.constant 9.99999974E-6 : f32
    %134 = vector.broadcast %cst_104 : f32 to vector<8x1xf32>
    %135 = arith.addf %133, %134 : vector<8x1xf32>
    %136 = math.rsqrt %135 : vector<8x1xf32>
    %137 = vector.broadcast %136 : vector<8x1xf32> to vector<8x32xf32>
    %138 = arith.mulf %128, %137 : vector<8x32xf32>
    %139 = vector.broadcast %121 : vector<1x32xf32> to vector<8x32xf32>
    %140 = arith.mulf %138, %139 : vector<8x32xf32>
    %141 = vector.broadcast %122 : vector<1x32xf32> to vector<8x32xf32>
    %142 = arith.addf %140, %141 : vector<8x32xf32>
    %c0_105 = arith.constant 0 : index
    %c0_106 = arith.constant 0 : index
    %c0_107 = arith.constant 0 : index
    %143 = vector.load %arg14[%c0_105, %c0_106, %c0_107] : memref<1x8x32xf32, #tpu.memory_space<vmem>>, vector<1x8x32xf32>
    %144 = vector.shape_cast %143 : vector<1x8x32xf32> to vector<8x32xf32>
    %145 = vector.shape_cast %142 : vector<8x32xf32> to vector<1x8x32xf32>
    tpu.vector_store %arg14[%c0_105, %c0_106, %c0_107], %145 {strides = array<i32>} : memref<1x8x32xf32, #tpu.memory_space<vmem>>, vector<1x8x32xf32>,
    return
  }
  func.func @transform_0(%arg0: i32, %arg1: i32) -> (i32, i32, i32) {
    %c0_i32 = arith.constant 0 : i32
    %c0_i32_0 = arith.constant 0 : i32
    return %arg0, %arg1, %c0_i32 : i32, i32, i32
  }
  func.func @transform_1(%arg0: i32, %arg1: i32) -> (i32, i32, i32) {
    %c0_i32 = arith.constant 0 : i32
    %c0_i32_0 = arith.constant 0 : i32
    %c0_i32_1 = arith.constant 0 : i32
    return %arg0, %c0_i32, %c0_i32_0 : i32, i32, i32
  }
  func.func @transform_2(%arg0: i32, %arg1: i32) -> (i32, i32) {
    %c0_i32 = arith.constant 0 : i32
    %c0_i32_0 = arith.constant 0 : i32
    %c0_i32_1 = arith.constant 0 : i32
    return %c0_i32, %c0_i32_0 : i32, i32
  }
  func.func @transform_3(%arg0: i32, %arg1: i32) -> (i32, i32) {
    %c0_i32 = arith.constant 0 : i32
    %c0_i32_0 = arith.constant 0 : i32
    %c0_i32_1 = arith.constant 0 : i32
    return %c0_i32, %c0_i32_0 : i32, i32
  }
  func.func @transform_4(%arg0: i32, %arg1: i32) -> (i32, i32) {
    %c0_i32 = arith.constant 0 : i32
    %c0_i32_0 = arith.constant 0 : i32
    %c0_i32_1 = arith.constant 0 : i32
    return %c0_i32, %c0_i32_0 : i32, i32
  }
  func.func @transform_5(%arg0: i32, %arg1: i32) -> (i32, i32) {
    %c0_i32 = arith.constant 0 : i32
    %c0_i32_0 = arith.constant 0 : i32
    %c0_i32_1 = arith.constant 0 : i32
    return %c0_i32, %c0_i32_0 : i32, i32
  }
  func.func @transform_6(%arg0: i32, %arg1: i32) -> (i32, i32) {
    %c0_i32 = arith.constant 0 : i32
    %c0_i32_0 = arith.constant 0 : i32
    %c0_i32_1 = arith.constant 0 : i32
    return %c0_i32, %c0_i32_0 : i32, i32
  }
  func.func @transform_7(%arg0: i32, %arg1: i32) -> (i32, i32) {
    %c0_i32 = arith.constant 0 : i32
    %c0_i32_0 = arith.constant 0 : i32
    %c0_i32_1 = arith.constant 0 : i32
    return %c0_i32, %c0_i32_0 : i32, i32
  }
  func.func @transform_8(%arg0: i32, %arg1: i32) -> (i32, i32) {
    %c0_i32 = arith.constant 0 : i32
    %c0_i32_0 = arith.constant 0 : i32
    %c0_i32_1 = arith.constant 0 : i32
    return %c0_i32, %c0_i32_0 : i32, i32
  }
  func.func @transform_9(%arg0: i32, %arg1: i32) -> (i32, i32) {
    %c0_i32 = arith.constant 0 : i32
    %c0_i32_0 = arith.constant 0 : i32
    %c0_i32_1 = arith.constant 0 : i32
    return %c0_i32, %c0_i32_0 : i32, i32
  }
  func.func @transform_10(%arg0: i32, %arg1: i32) -> (i32, i32) {
    %c0_i32 = arith.constant 0 : i32
    %c0_i32_0 = arith.constant 0 : i32
    %c0_i32_1 = arith.constant 0 : i32
    return %c0_i32, %c0_i32_0 : i32, i32
  }
  func.func @transform_11(%arg0: i32, %arg1: i32) -> (i32, i32) {
    %c0_i32 = arith.constant 0 : i32
    %c0_i32_0 = arith.constant 0 : i32
    %c0_i32_1 = arith.constant 0 : i32
    return %c0_i32, %c0_i32_0 : i32, i32
  }
  func.func @transform_12(%arg0: i32, %arg1: i32) -> (i32, i32, i32) {
    %c0_i32 = arith.constant 0 : i32
    %c0_i32_0 = arith.constant 0 : i32
    return %arg0, %arg1, %c0_i32 : i32, i32, i32
  }
}

</mosaic_0001>

<bundles_post_ra>
// kernel: tpu_custom_call.1
= control target key start
LH: loop header
LB: loop body
LE: loop exit
PB: predicated region body
PF: predicated region fallthrough
CT: control target
= control target key end

     0   :  { %s2027_s0 = inlined_call_operand.vmem [shape: f32[2,8,32], index: 0, kind: input, shape index: {}]   ;;  %s2028_s1 = inlined_call_operand.hbm [shape: bf16[2,8,32], index: 1, kind: input, shape index: {}]   ;;  %s2029_s2 = inlined_call_operand.vmem [shape: bf16[32,32], index: 2, kind: input, shape index: {}]   ;;  %s2030_s3 = inlined_call_operand.vmem [shape: bf16[32,64], index: 3, kind: input, shape index: {}]   ;;  %s2031_s4 = inlined_call_operand.hbm [shape: bf16[32,64], index: 4, kind: input, shape index: {}]   ;;  %s2032_s5 = inlined_call_operand.vmem [shape: f32[1,64], index: 5, kind: input, shape index: {}]   ;;  %s2033_s6 = inlined_call_operand.vmem [shape: bf16[64,32], index: 6, kind: input, shape index: {}]   ;;  %s2034_s7 = inlined_call_operand.vmem [shape: f32[1,32], index: 7, kind: input, shape index: {}]   ;;  %s2035_s8 = inlined_call_operand.vmem [shape: f32[1,32], index: 8, kind: input, shape index: {}]   ;;  %s2036_s9 = inlined_call_operand.vmem [shape: f32[1,32], index: 9, kind: input, shape index: {}]   ;;  %s2037_s10 = inlined_call_operand.vmem [shape: f32[1,32], index: 10, kind: input, shape index: {}]   ;;  %s2038_s11 = inlined_call_operand.vmem [shape: f32[1,32], index: 11, kind: input, shape index: {}]   ;;  %s2039_s12 = inlined_call_operand.hbm [shape: f32[2,8,32], index: 12, kind: output, shape index: {}]  }
   0x1   :  { %2043 = sst [smem:[#allocation21_spill]] %s2031_s4 }
   0x2   :  { %2044 = sst [smem:[#allocation22_spill]] %s2037_s10 }
   0x3   :  { %2045 = sst [smem:[#allocation23_spill]] %s2038_s11 }
   0x4   :  { %2046 = sst [smem:[#allocation24_spill]] %s2039_s12 }
   0x5   :  { %17 = vsyncpa [#allocation10], 0 }
   0x6   :  { %19 = vsyncpa [#allocation10 + $0x1], 0 }
   0x7   :  { %20 = vsyncpa [#allocation13], 0 }
   0x8   :  { %21 = vsyncpa [#allocation11], 0 }
   0x9   :  { %23 = vsyncpa [#allocation11 + $0x1], 0  ;;  %s1715_s21 = smov 0   ;;  %s1717_s22 = smov 0  }
   0xa   :  { %s1719_s23 = smov 0   ;;  %s1721_s24 = smov 0  }
   0xb   :  { %s1723_s25 = smov 0   ;;  %s1725_s26 = smov 0  }
   0xc LB: > { %2047 = sst [smem:[#allocation18_spill]] %s1611_s21  ;;  %s1279_s27 = sadd.s32 4294967295, %s1631_s26   ;;  %s1631_s26 = sphi %s1725_s26, %s29_s26   ;;  %s1627_s25 = sphi %s1723_s25, %s2067_s25   ;;  %s1623_s24 = sphi %s1721_s24, %s2066_s24   ;;  %s1619_s23 = sphi %s1719_s23, %s2065_s23   ;;  %s1615_s22 = sphi %s1717_s22, %s2064_s22   ;;  %s1611_s21 = sphi %s1715_s21, %s2063_s21  }
   0xd   : > { %p1281_p0 = scmp.ge.s32.totalorder %s1631_s26, 1  ;;  %p1747_p1 = scmp.eq.s32.totalorder %s1279_s27, 0 }
   0xe   : > { %p338_p2 = scmp.lt.s32.totalorder %s1631_s26, 3  ;;  %s2049_s4 = sld [smem:[#allocation21_spill]] }
   0xf   : > { %s1633_s15 = smov [#allocation12]   ;;  %p1283_p6 = scmp.ge.s32.totalorder %s1631_s26, 2 }
  0x10   : > { %p1755_p3 = pnand %p1281_p0, %p338_p2  ;;  %s357_s16 = sshll.u32 %s1633_s15, 4  ;;  %s358_s16 = int_to_ptr.vmem [resolvable:$true] %s357_s16 }
  0x11   : > { %s1634_s17 = smov 64   ;;  %s1635_s18 = smov 4  }
  0x12   : > { %p1365_p4 = pneg %p1755_p3  ;;  %s1280_s19 = sadd.s32 4294967294, %s1631_s26  }
  0x13   : > { %s41_s20 = sadd.s32 1, %s1627_s25  ;;  %s76_s29 = sadd.s32 1, %s1619_s23 }
  0x14   : > { %s355_s13 = sshll.u32 %s2049_s4, 4  ;;  %p1366_p5 = pnand %p1365_p4, %p1747_p1  ;;  %s356_s13 = int_to_ptr.hbm [resolvable:$true] %s355_s13 }
  0x15   : > { %p43_p7 = scmp.ge.s32.totalorder %s41_s20, 2  ;;  %p83_p8 = scmp.ne.s32.totalorder %s1619_s23, %s1615_s22 }
  0x16   : > { %1368 = dma.hbm_to_vmem [thread:$0]  (!%p1366_p5), %s356_s13, 256, %s358_s16, [#allocation13], %s1634_s17, %s1634_s17, %s1635_s18  }
  0x17   : > { %p84_p9 = scmp.eq.s32.totalorder %s1631_s26, 0  ;;  %p89_p10 = scmp.ne.s32.totalorder %s1615_s22, %s1611_s21 }
  0x18   : > { %s2069_s20 = smov (%p43_p7, %s41_s20), 0  ;;  %p325_p13 = scmp.eq.s32.totalorder %s1279_s27, 1 }
  0x19   : > { %2051 = sst [smem:[#allocation19_spill]] %s2069_s20  ;;  %p1774_p11 = por %p84_p9, %p83_p8 }
  0x1a   : > { %p1780_p12 = por %p1747_p1, %p89_p10  ;;  %s73_s15 = ssub.s32 %s1627_s25, %s2069_s20 }
  0x1b   : > { %p74_p0 = scmp.eq.s32.totalorder %s73_s15, 0  ;;  %p331_p2 = scmp.eq.s32.totalorder %s1280_s19, 1 }
  0x1c   : > { %p1786_p4 = por %p325_p13, %p83_p8  ;;  %p1378_p5 = scmp.lt.s32.totalorder %s1631_s26, 2 }
  0x1d   : > { %s1792_s17 = scalar_select %p74_p0, %s1619_s23, %s76_s29  }
  0x1e   : > { %p1794_p7 = por %p331_p2, %p89_p10  ;;  %s402_s4 = sand.u32 1, %s1619_s23  }
  0x1f   : > { %2055 = sst [smem:[#allocation20_spill]] %s1792_s17  ;;  %s1284_s21 = sshll.u32 %s402_s4, 2 }
  0x20   : > { %s1285_s11 = sshll.u32 %s1627_s25, 2  ;;  %s406_s15 = scalar_lea.vmem [#allocation9], %s1284_s21 }
  0x21   : > { %s410_s27 = scalar_lea.hbm %s2028_s1, %s1285_s11  ;;  %s414_s19 = sshll.u32 %s406_s15, 4  ;;  %s415_s19 = int_to_ptr.vmem [resolvable:$true] %s414_s19 }
  0x22   : > { %s412_s10 = sshll.u32 %s410_s27, 4  ;;  %p1370_p8 = pnand %p1378_p5, %p1774_p11  ;;  %s413_s10 = int_to_ptr.hbm [resolvable:$true] %s412_s10 }
  0x23   : > { %s403_s29 = scalar_lea.sflag [#allocation10], %s402_s4  ;;  %423 = sbr.rel (%p1755_p3) target bundleno = 1881 (0x759), region = 68 }
  0x24   : > { %1372 = dma.hbm_to_vmem [thread:$0]  (!%p1370_p8), %s413_s10, 64, %s415_s19, %s403_s29  }
  0x25   : > { %s1808_s17 = sand.u32 (!%p1755_p3), 1, %s1615_s22  }
  0x26   : > { %s1287_s12 = sshll.u32 (!%p1755_p3), %s1808_s17, 2  ;;  %s426_s11 = scalar_lea.sflag (!%p1755_p3), [#allocation10], %s1808_s17 }
  0x27   : > { %s429_s21 = scalar_lea.vmem (!%p1755_p3), [#allocation9], %s1287_s12 }
  0x28   : > { %1598 = dma.done.wait (%p1780_p12), %s426_s11, 64  }
  0x29   : > { %1600 = vsyncadd (%p1780_p12), %s426_s11, 4294967232 }
  0x2a   : > { %1602 = dma.done.wait (%p1747_p1), [#allocation13], 256  }
  0x2b   : > { %1604 = vsyncadd (%p1747_p1), [#allocation13], 4294967040  ;;  %p483_p3 = scmp.lt.s32.totalorder %s1623_s24, 1  ;;  %v1348_v0 = vld [vmem:[%s2030_s3 + $0x8] sm:$0xff]  ;;  %v1347_v2 = vld [vmem:[%s2030_s3] sm:$0xff]  ;;  %vm512_vm0 = vcmask 261120  }
  0x2c   : > { %v1350_v1 = vld [vmem:[%s2029_s2 + $0x8] sm:$0xff]  ;;  %v1349_v3 = vld [vmem:[%s2029_s2] sm:$0xff]  ;;  %522 = vmatpush.bf16.msra.mxu0 %v1348_v0  ;;  %v495_v6 = vld [vmem:[%s429_s21] sm:$0xf]  ;;  %vm530_vm1 = vcmask 60416   ;;  %s1637_s21 = smov 120  }
  0x2d   : > { %s484_s4 = scalar_select %p483_p3, %s1623_s24, 1  ;;  %595 = vmatpush.bf16.msra.mxu1 %v1350_v1  ;;  %vm634_vm2 = vcmask 64512   ;;  %vm625_vm3 = vcmask 7168   ;;  %v1639_v34 = vmov -inf   ;;  %v1640_v35 = vmov 0.0  }
  0x2e   : > { %626 = vst.msk [vmem:[#allocation5] sm:$0xff] %vm625_vm3, %v1639_v34  ;;  %s1641_s14 = smov 88   ;;  %s1642_s20 = smov 80   ;;  %v1644_v48 = vmov 0   ;;  %vm850_vm4 = vcmask 1043456   ;;  %vm977_vm5 = vcmask 130112  }
  0x2f   : > { %s1290_s10 = sshll.u32 %s484_s4, 3  ;;  %s1636_s4 = smov 112   ;;  %627 = vst.msk [vmem:[#allocation5 + $0x8] sm:$0xff] %vm625_vm3, %v1639_v34  ;;  %1447 = vset.pattern.permute.xlu2 %v1644_v48  ;;  %1446 = vset.pattern.permute.xlu0 %v1644_v48  ;;  %vm983_vm6 = vcmask 195712   ;;  %vm989_vm7 = vcmask 261312   ;;  %vm1107_vm12 = vcmask 523264  }
  0x30   : > { %s489_s30 = scalar_lea.vmem %s2027_s0, %s1290_s10  ;;  %523 = vmatpush.bf16.msra.mxu0 %v1347_v2  ;;  %s1638_s10 = smov 104   ;;  %628 = vst.msk [vmem:[#allocation5 + $0x10] sm:$0xff] %vm625_vm3, %v1639_v34  ;;  %1448 = vset.pattern.permute.xlu1 %v1644_v48 }
  0x31   : > { %v1837_v4 = vld [vmem:[%s489_s30] sm:$0xff]  ;;  %596 = vmatpush.bf16.msra.mxu1 %v1349_v3  ;;  %629 = vst.msk [vmem:[#allocation5 + $0x18] sm:$0xff] %vm625_vm3, %v1639_v34  ;;  %s1643_s30 = smov 72   ;;  %s1645_s27 = smov 96  }
  0x32   : > { %v568_v5 = vpack.c.bf16 %v1837_v4, %v1837_v4  ;;  %632 = vst.msk [vmem:[#allocation6 + $0x10] sm:$0xff] %vm625_vm3, %v1640_v35  ;;  %s1646_s15 = smov 16   ;;  %s1647_s13 = smov 24  }
  0x33   : > { %1299 = vmatmul.msk.bf16.vlgmr.msra.gmra.mxu0 %vm512_vm0, %v495_v6  ;;  %630 = vst.msk [vmem:[#allocation6] sm:$0xff] %vm625_vm3, %v1640_v35  ;;  %s1648_s19 = smov 8   ;;  %s1289_s12 = sshll.u32 %s1808_s17, 3 }
  0x34   : > { %1308 = vmatmul.msk.bf16.vlgmr.msra.gmra.mxu1 %vm512_vm0, %v568_v5  ;;  %631 = vst.msk [vmem:[#allocation6 + $0x8] sm:$0xff] %vm625_vm3, %v1640_v35  ;;  %s1344_s11 = sshll.u32 %s1623_s24, 3  ;;  %s482_s24 = scalar_lea.vmem [#allocation14], %s1289_s12 }
  0x35   : > { %633 = vst.msk [vmem:[#allocation6 + $0x18] sm:$0xff] %vm625_vm3, %v1640_v35  ;;  %v1885_v38 = vld [vmem:[#allocation5] sm:$0xff]  ;;  %s1172_s29 = sshll.u32 %s482_s24, 4  ;;  %s1173_s29 = int_to_ptr.vmem [resolvable:$true] %s1172_s29 }
  0x36   : > { %635 = vst.msk [vmem:[#allocation7] sm:$0xff] %vm634_vm2, %v1640_v35  ;;  %v724_v53 = vld [vmem:[#allocation5 + $0x8] sm:$0xff] }
  0x37   : > { %636 = vst.msk [vmem:[#allocation7 + $0x8] sm:$0xff] %vm634_vm2, %v1640_v35  ;;  %v725_v49 = vld [vmem:[#allocation5 + $0x10] sm:$0xff] }
  0x38   : > { %637 = vst.msk [vmem:[#allocation7 + $0x10] sm:$0xff] %vm634_vm2, %v1640_v35  ;;  %v1904_v54 = vld [vmem:[#allocation5 + $0x18] sm:$0xff] }
  0x39   : > { %638 = vst.msk [vmem:[#allocation7 + $0x18] sm:$0xff] %vm634_vm2, %v1640_v35 }
  0xb0   : > { %v525_v7 = vpop.f32.mrf.mxu0 }
  0xb1   : > { %v598_v8 = vpop.f32.mrf.mxu1  ;;  %v1843_v9 = vpack.c.bf16 %v525_v7, %v525_v7 }
  0xb2   : > { %v602_v10 = vpack.c.bf16 %v598_v8, %v598_v8 }
  0xb3   : > { %531 = vst.msk [vmem:[#allocation3] sm:$0xf] %vm530_vm1, %v1843_v9  ;;  %547 = vrot.lane.b32.xlu1 %v1843_v9, %s1636_s4  ;;  %537 = vrot.lane.b32.xlu0 %v1843_v9, %s1637_s21 }
  0xb4   : > { %611 = vrot.lane.b32.xlu2 %v602_v10, %s1636_s4  ;;  %604 = vst.msk [vmem:[#allocation2] sm:$0xf] %vm530_vm1, %v602_v10  ;;  %s1159_s4 = scalar_lea.sflag [#allocation11], %s1808_s17 }
  0xb8   : > { %v527_v11 = vpop.f32.mrf.mxu0 }
  0xb9   : > { %v600_v12 = vpop.f32.mrf.mxu1 }
  0xba   : > { %v639_v13 = vld [vmem:[#allocation3] sm:$0xf] }
  0xbb   : > { %557 = vrot.lane.b32.xlu1 %v1843_v9, %s1638_s10  ;;  %v651_v14 = vsel %vm634_vm2, %v639_v13, 0  ;;  %606 = vrot.lane.b32.xlu0 %v602_v10, %s1637_s21  ;;  %v621_v15 = vld [vmem:[#allocation2] sm:$0xf] }
  0xbc   : > { %616 = vrot.lane.b32.xlu2 %v602_v10, %s1638_s10  ;;  %660 = vmatpush.bf16.xpose.msra.mxu2 %v651_v14  ;;  %s2057_s10 = sld [smem:[#allocation22_spill]] }
  0xc3   : > { %1309 = vmatmul.msk.bf16.vlgmr.msra.gmra.mxu2 %vm634_vm2, %v621_v15 }
 0x10e   : > { %v612_v16 = vpop.permute.xlu2 %611 }
 0x10f   : > { %615 = vst.msk [vmem:[#allocation2 + $0x8] sm:$0xf] %vm530_vm1, %v612_v16 }
 0x116   : > { %v617_v17 = vpop.permute.xlu2 %616  ;;  %v623_v26 = vld [vmem:[#allocation2 + $0x8] sm:$0xf] }
 0x117   : > { %620 = vst.msk [vmem:[#allocation2 + $0xc] sm:$0xf] %vm530_vm1, %v617_v17 }
 0x11e   : > { %v624_v30 = vld [vmem:[#allocation2 + $0xc] sm:$0xf] }
 0x125   : > { %v548_v18 = vpop.permute.xlu1 %547  ;;  %v538_v19 = vpop.permute.xlu0 %537 }
 0x126   : > { %551 = vst.msk [vmem:[#allocation3 + $0x8] sm:$0xf] %vm530_vm1, %v548_v18 }
 0x127   : > { %541 = vst.msk [vmem:[#allocation3 + $0x4] sm:$0xf] %vm530_vm1, %v538_v19 }
 0x12d   : > { %v558_v20 = vpop.permute.xlu1 %557  ;;  %v641_v21 = vld [vmem:[#allocation3 + $0x8] sm:$0xf]  ;;  %v607_v22 = vpop.permute.xlu0 %606 }
 0x12e   : > { %561 = vst.msk [vmem:[#allocation3 + $0xc] sm:$0xf] %vm530_vm1, %v558_v20  ;;  %v640_v23 = vld [vmem:[#allocation3 + $0x4] sm:$0xf]  ;;  %v689_v24 = vsel %vm634_vm2, %v641_v21, 0 }
 0x12f   : > { %610 = vst.msk [vmem:[#allocation2 + $0x4] sm:$0xf] %vm530_vm1, %v607_v22  ;;  %v670_v25 = vsel %vm634_vm2, %v640_v23, 0  ;;  %698 = vmatpush.bf16.xpose.msrb.mxu0 %v689_v24 }
 0x130   : > { %679 = vmatpush.bf16.xpose.msra.mxu3 %v670_v25 }
 0x135   : > { %v642_v27 = vld [vmem:[#allocation3 + $0xc] sm:$0xf] }
 0x136   : > { %v622_v28 = vld [vmem:[#allocation2 + $0x4] sm:$0xf]  ;;  %1311 = vmatmul.msk.bf16.vlgmr.msrb.gmra.mxu0 %vm634_vm2, %v623_v26  ;;  %v708_v29 = vsel %vm634_vm2, %v642_v27, 0 }
 0x137   : > { %1310 = vmatmul.msk.bf16.vlgmr.msra.gmra.mxu3 %vm634_vm2, %v622_v28  ;;  %717 = vmatpush.bf16.xpose.msrb.mxu1 %v708_v29 }
 0x13e   : > { %1312 = vmatmul.msk.bf16.vlgmr.msrb.gmra.mxu1 %vm634_vm2, %v624_v30 }
 0x146   : > { %v1865_v31 = vpop.f32.mrf.mxu2 }
 0x147   : > { %v727_v32 = vsel %vm634_vm2, %v1865_v31, -inf }
 0x148   : > { %728 = vmax.xlane.f32.xlu2 %v727_v32 }
 0x14e   : > { %v664_v33 = vpop.f32.mrf.mxu2 }
 0x1b3   : > { %v1881_v36 = vpop.f32.mrf.mxu0 }
 0x1b4   : > { %v733_v37 = vsel %vm634_vm2, %v1881_v36, -inf }
 0x1b5   : > { %734 = vmax.xlane.f32.xlu1 %v733_v37 }
 0x1ba   : > { %v1887_v39 = vpop.f32.mrf.mxu3 }
 0x1bb   : > { %v1889_v40 = vpop.f32.mrf.mxu1  ;;  %v730_v41 = vsel %vm634_vm2, %v1887_v39, -inf  ;;  %v729_v42 = vpop.xlane.xlu2 %728 }
 0x1bc   : > { %731 = vmax.xlane.f32.xlu0 %v730_v41  ;;  %v1894_v43 = vmax.f32 %v1885_v38, %v729_v42  ;;  %v702_v44 = vpop.f32.mrf.mxu0  ;;  %v736_v45 = vsel %vm634_vm2, %v1889_v40, -inf  ;;  %v789_v41 = vld [vmem:[#allocation6 + $0x10] sm:$0xff] }
 0x1bd   : > { %737 = vmax.xlane.f32.xlu2 %v736_v45 }
 0x1be   : > { %932 = vst.msk [vmem:[#allocation5] sm:$0xff] %vm625_vm3, %v1894_v43 }
 0x1c2   : > { %v683_v46 = vpop.f32.mrf.mxu3 }
 0x1c3   : > { %v721_v47 = vpop.f32.mrf.mxu1  ;;  %v790_v46 = vld [vmem:[#allocation6 + $0x18] sm:$0xff] }
 0x1ce   : > { %542 = vrot.lane.b32.xlu1 %v1843_v9, %s1641_s14 }
 0x1d6   : > { %552 = vrot.lane.b32.xlu1 %v1843_v9, %s1642_s20 }
 0x1de   : > { %562 = vrot.lane.b32.xlu1 %v1843_v9, %s1643_s30  ;;  %s2058_s30 = sld [smem:[#allocation24_spill]] }
 0x1e4   : > { %s1565_s12 = scalar_lea.hbm %s2058_s30, 16 }
 0x228   : > { %v735_v50 = vpop.xlane.xlu1 %734 }
 0x229   : > { %v741_v51 = vmax.f32 %v725_v49, %v735_v50 }
 0x22b   : > { %v745_v52 = vsub.f32 %v725_v49, %v741_v51  ;;  %934 = vst.msk [vmem:[#allocation5 + $0x10] sm:$0xff] %vm625_vm3, %v741_v51  ;;  %767 = vperm.xlu2 %1447, %v741_v51  }
 0x22d   : > { %v751_v20 = vmul.f32 1.442695, %v745_v52 }
 0x22f   : > { %v732_v55 = vpop.xlane.xlu0 %731 }
 0x230   : > { %v740_v56 = vmax.f32 %v724_v53, %v732_v55  ;;  %v738_v57 = vpop.xlane.xlu2 %737 }
 0x231   : > { %v1907_v58 = vmax.f32 %v1904_v54, %v738_v57 }
 0x232   : > { %v744_v59 = vsub.f32 %v724_v53, %v740_v56  ;;  %933 = vst.msk [vmem:[#allocation5 + $0x8] sm:$0xff] %vm625_vm3, %v740_v56  ;;  %762 = vperm.xlu0 %1446, %v740_v56   ;;  %v743_v56 = vsub.f32 %v1885_v38, %v1894_v43 }
 0x233   : > { %v746_v60 = vsub.f32 %v1904_v54, %v1907_v58  ;;  %935 = vst.msk [vmem:[#allocation5 + $0x18] sm:$0xff] %vm625_vm3, %v1907_v58  ;;  %772 = vperm.xlu2 %1447, %v1907_v58  }
 0x234   : > { %v749_v19 = vmul.f32 1.442695, %v744_v59  ;;  %v747_v58 = vmul.f32 1.442695, %v743_v56  ;;  %v817_v59 = vld [vmem:[#allocation7 + $0x10] sm:$0xff] }
 0x23a   : > { %533 = vrot.lane.b32.xlu0 %v1843_v9, %s1645_s27  ;;  %s1170_s27 = scalar_lea.hbm %s2058_s30, %s1344_s11 }
 0x23b   : > { %757 = vperm.xlu2 %1447, %v1894_v43   ;;  %s1174_s28 = sshll.u32 %s1170_s27, 4  ;;  %s1175_s28 = int_to_ptr.hbm [resolvable:$true] %s1174_s28 }
 0x23c   : > { %s1559_s21 = sshra.s32 %s1175_s28, 4  ;;  %s1560_s21 = int_to_ptr.hbm [resolvable:$true] %s1559_s21 }
 0x23d   : > { %s1561_s11 = scalar_lea.hbm %s1560_s21, 8  ;;  %p1566_p11 = scmp.lt.s32.totalorder %s1560_s21, %s2058_s30 }
 0x23e   : > { %p1562_p1 = scmp.ne.s32.totalorder %s1560_s21, %s1561_s11  ;;  %p1567_p12 = scmp.lt.s32.totalorder %s1565_s12, %s1561_s11 }
 0x240   : > { %v543_v61 = vpop.permute.xlu1 %542  ;;  %p1563_p9 = pnand %p1562_p1, %p1786_p4  ;;  %p1568_p13 = por %p1567_p12, %p1566_p11 }
 0x241   : > { %546 = vst.msk [vmem:[#allocation4 + $0x4] sm:$0xf] %vm530_vm1, %v543_v61 }
 0x242   : > { %p1564_p10 = pneg %p1563_p9 }
 0x244   : > { %p1569_p0 = pnand %p1568_p13, %p1564_p10 }
 0x248   : > { %v553_v62 = vpop.permute.xlu1 %552  ;;  %v644_v63 = vld [vmem:[#allocation4 + $0x4] sm:$0xf] }
 0x249   : > { %556 = vst.msk [vmem:[#allocation4 + $0x8] sm:$0xf] %vm530_vm1, %v553_v62  ;;  %v871_v0 = vsel %vm850_vm4, %v644_v63, 0  ;;  %v788_v62 = vld [vmem:[#allocation6 + $0x8] sm:$0xff] }
 0x24a   : > { %880 = vmatpush.bf16.msrb.mxu3 %v871_v0 }
 0x250   : > { %v563_v1 = vpop.permute.xlu1 %562  ;;  %v645_v2 = vld [vmem:[#allocation4 + $0x8] sm:$0xf] }
 0x251   : > { %566 = vst.msk [vmem:[#allocation4 + $0xc] sm:$0xf] %vm530_vm1, %v563_v1  ;;  %v890_v3 = vsel %vm850_vm4, %v645_v2, 0 }
 0x252   : > { %899 = vmatpush.bf16.msra.mxu0 %v890_v3 }
 0x258   : > { %v646_v5 = vld [vmem:[#allocation4 + $0xc] sm:$0xf] }
 0x259   : > { %v909_v6 = vsel %vm850_vm4, %v646_v5, 0 }
 0x25a   : > { %918 = vmatpush.bf16.msra.mxu1 %v909_v6  ;;  %v787_v6 = vld [vmem:[#allocation6] sm:$0xff] }
 0x285   : > { %v768_v7 = vpop.permute.xlu2 %767 }
 0x286   : > { %v777_v8 = vsub.f32 %v1881_v36, %v768_v7 }
 0x288   : > { %v783_v9 = vmul.f32 1.442695, %v777_v8 }
 0x28a   : > { %1455 = vpow2.f32 %v783_v9  ;;  %v816_v9 = vld [vmem:[#allocation7 + $0x8] sm:$0xff] }
 0x28d   : > { %v773_v10 = vpop.permute.xlu2 %772 }
 0x28e   : > { %v778_v11 = vsub.f32 %v1889_v40, %v773_v10 }
 0x290   : > { %v1456_v12 = vpop.eup %1455  ;;  %v785_v13 = vmul.f32 1.442695, %v778_v11 }
 0x291   : > { %v845_v14 = vpack.c.bf16 %v1456_v12, %v1456_v12  ;;  %v801_v15 = vsel %vm634_vm2, %v1456_v12, 0.0 }
 0x292   : > { %1457 = vpow2.f32 %v785_v13  ;;  %802 = vadd.xlane.f32.xlu2 %v801_v15 }
 0x293   : > { %1315 = vmatmul.msk.bf16.vlgmr.msra.gmra.mxu0 %vm634_vm2, %v845_v14  ;;  %1459 = vpow2.f32 %v749_v19  ;;  %v818_v19 = vld [vmem:[#allocation7 + $0x18] sm:$0xff] }
 0x294   : > { %1461 = vpow2.f32 %v751_v20 }
 0x295   : > { %v758_v21 = vpop.permute.xlu2 %757 }
 0x296   : > { %v775_v24 = vsub.f32 %v1865_v31, %v758_v21 }
 0x298   : > { %v1458_v16 = vpop.eup %1457  ;;  %v779_v27 = vmul.f32 1.442695, %v775_v24 }
 0x299   : > { %v846_v17 = vpack.c.bf16 %v1458_v16, %v1458_v16  ;;  %v804_v18 = vsel %vm634_vm2, %v1458_v16, 0.0  ;;  %v1460_v26 = vpop.eup %1459 }
 0x29a   : > { %805 = vadd.xlane.f32.xlu0 %v804_v18  ;;  %v1462_v29 = vpop.eup %1461  ;;  %v792_v1 = vmul.f32 %v1460_v26, %v788_v62 }
 0x29b   : > { %1316 = vmatmul.msk.bf16.vlgmr.msra.gmra.mxu1 %vm634_vm2, %v846_v17  ;;  %v793_v42 = vmul.f32 %v1462_v29, %v789_v41 }
 0x2a4   : > { %v763_v22 = vpop.permute.xlu0 %762 }
 0x2a5   : > { %v776_v23 = vsub.f32 %v1887_v39, %v763_v22  ;;  %v753_v39 = vmul.f32 1.442695, %v746_v60 }
 0x2a7   : > { %v781_v25 = vmul.f32 1.442695, %v776_v23 }
 0x2a9   : > { %1463 = vpow2.f32 %v781_v25 }
 0x2aa   : > { %826 = vperm.xlu2 %1447, %v1460_v26   ;;  %1465 = vpow2.f32 %v779_v27 }
 0x2ab   : > { %1467 = vpow2.f32 %v753_v39 }
 0x2ac   : > { %v534_v28 = vpop.permute.xlu0 %533 }
 0x2ad   : > { %536 = vst.msk [vmem:[#allocation4] sm:$0xf] %vm530_vm1, %v534_v28 }
 0x2ae   : > { %831 = vperm.xlu0 %1446, %v1462_v29  }
 0x2af   : > { %v1464_v30 = vpop.eup %1463 }
 0x2b0   : > { %v798_v32 = vsel %vm634_vm2, %v1464_v30, 0.0  ;;  %v844_v33 = vpack.c.bf16 %v1464_v30, %v1464_v30  ;;  %v1466_v31 = vpop.eup %1465 }
 0x2b1   : > { %799 = vadd.xlane.f32.xlu1 %v798_v32  ;;  %v843_v36 = vpack.c.bf16 %v1466_v31, %v1466_v31  ;;  %v795_v37 = vsel %vm634_vm2, %v1466_v31, 0.0  ;;  %v1468_v40 = vpop.eup %1467  ;;  %v815_v31 = vld [vmem:[#allocation7] sm:$0xff] }
 0x2b2   : > { %1314 = vmatmul.msk.bf16.vlgmr.msrb.gmra.mxu3 %vm634_vm2, %v844_v33  ;;  %v794_v47 = vmul.f32 %v1468_v40, %v790_v46 }
 0x2b4   : > { %v643_v34 = vld [vmem:[#allocation4] sm:$0xf] }
 0x2b5   : > { %v852_v35 = vsel %vm850_vm4, %v643_v34, 0 }
 0x2b6   : > { %861 = vmatpush.bf16.msrb.mxu2 %v852_v35 }
 0x2b9   : > { %1313 = vmatmul.msk.bf16.vlgmr.msrb.gmra.mxu2 %vm634_vm2, %v843_v36  ;;  %796 = vadd.xlane.f32.xlu1 %v795_v37 }
 0x2d2   : > { %836 = vperm.xlu1 %1448, %v1468_v40  }
 0x305   : > { %v803_v44 = vpop.xlane.xlu2 %802 }
 0x306   : > { %v809_v45 = vadd.f32 %v803_v44, %v793_v42 }
 0x308   : > { %813 = vst.msk [vmem:[#allocation6 + $0x10] sm:$0xff] %vm625_vm3, %v809_v45 }
 0x30d   : > { %v806_v48 = vpop.xlane.xlu0 %805  ;;  %v827_v10 = vpop.permute.xlu2 %826 }
 0x30e   : > { %v810_v49 = vadd.f32 %v806_v48, %v794_v47  ;;  %v840_v11 = vmul.f32 %v827_v10, %v816_v9  ;;  %v1649_v48 = vmov 32.0   ;;  %v1450_v10 = vld [vmem:[%s2036_s9] ss:$0 sm:$0xff] }
 0x30f   : > { %v942_v50 = vld [vmem:[#allocation6 + $0x10] sm:$0xff] }
 0x310   : > { %814 = vst.msk [vmem:[#allocation6 + $0x18] sm:$0xff] %vm625_vm3, %v810_v49  ;;  %v901_v51 = vpop.f32.mrf.mxu0  ;;  %1469 = vrcp.f32 %v942_v50 }
 0x316   : > { %v1470_v52 = vpop.eup %1469 }
 0x317   : > { %960 = vperm.xlu2 %1447, %v1470_v52   ;;  %v943_v53 = vld [vmem:[#allocation6 + $0x18] sm:$0xff] }
 0x318   : > { %v903_v54 = vpop.f32.mrf.mxu0  ;;  %v920_v55 = vpop.f32.mrf.mxu1  ;;  %1471 = vrcp.f32 %v943_v53 }
 0x319   : > { %1473 = vpow2.f32 %v747_v58 }
 0x31e   : > { %v1472_v57 = vpop.eup %1471 }
 0x31f   : > { %965 = vperm.xlu1 %1448, %v1472_v57   ;;  %v1474_v5 = vpop.eup %1473 }
 0x320   : > { %v832_v60 = vpop.permute.xlu0 %831  ;;  %v922_v61 = vpop.f32.mrf.mxu1  ;;  %v791_v38 = vmul.f32 %v1474_v5, %v787_v6 }
 0x321   : > { %v841_v63 = vmul.f32 %v832_v60, %v817_v59  ;;  %v1351_v60 = vld [vmem:[#allocation12] sm:$0xff]  ;;  %v1356_v61 = vld [vmem:[%s2033_s6 + $0x18] sm:$0xff] }
 0x322   : > { %1115 = vmatpush.bf16.msra.mxu3 %v1356_v61 }
 0x323   : > { %v926_v0 = vadd.f32 %v901_v51, %v841_v63 }
 0x324   : > { %v800_v2 = vpop.xlane.xlu1 %799 }
 0x325   : > { %930 = vst.msk [vmem:[#allocation7 + $0x10] sm:$0xff] %vm634_vm2, %v926_v0  ;;  %v808_v3 = vadd.f32 %v800_v2, %v792_v1  ;;  %v1355_v0 = vld [vmem:[%s2033_s6 + $0x10] sm:$0xff]  ;;  %v1354_v2 = vld [vmem:[%s2033_s6 + $0x8] sm:$0xff] }
 0x326   : > { %1116 = vmatpush.bf16.msra.mxu3 %v1355_v0 }
 0x327   : > { %812 = vst.msk [vmem:[#allocation6 + $0x8] sm:$0xff] %vm625_vm3, %v808_v3 }
 0x32a   : > { %1117 = vmatpush.bf16.msra.mxu3 %v1354_v2 }
 0x32c   : > { %v797_v43 = vpop.xlane.xlu1 %796  ;;  %v938_v25 = vld [vmem:[#allocation7 + $0x10] sm:$0xff] }
 0x32d   : > { %v807_v7 = vadd.f32 %v797_v43, %v791_v38 }
 0x32e   : > { %v941_v8 = vld [vmem:[#allocation6 + $0x8] sm:$0xff] }
 0x32f   : > { %811 = vst.msk [vmem:[#allocation6] sm:$0xff] %vm625_vm3, %v807_v7  ;;  %1475 = vrcp.f32 %v941_v8  ;;  %v1449_v8 = vld [vmem:[%s2035_s8] ss:$0 sm:$0xff] }
 0x335   : > { %v1476_v12 = vpop.eup %1475  ;;  %v882_v13 = vpop.f32.mrf.mxu3 }
 0x336   : > { %v925_v14 = vadd.f32 %v882_v13, %v840_v11  ;;  %955 = vperm.xlu0 %1446, %v1476_v12   ;;  %v940_v15 = vld [vmem:[#allocation6] sm:$0xff] }
 0x337   : > { %1477 = vrcp.f32 %v940_v15  ;;  %v1353_v15 = vld [vmem:[%s2033_s6] sm:$0xff] }
 0x338   : > { %929 = vst.msk [vmem:[#allocation7 + $0x8] sm:$0xff] %vm634_vm2, %v925_v14  ;;  %1479 = vrcp.f32 %v1649_v48  ;;  %1118 = vmatpush.bf16.msra.mxu3 %v1353_v15 }
 0x33c   : > { %v863_v16 = vpop.f32.mrf.mxu2 }
 0x33d   : > { %v1478_v17 = vpop.eup %1477  ;;  %v884_v18 = vpop.f32.mrf.mxu3 }
 0x33e   : > { %821 = vperm.xlu0 %1446, %v1474_v5   ;;  %950 = vperm.xlu2 %1447, %v1478_v17   ;;  %v1480_v49 = vpop.eup %1479 }
 0x33f   : > { %v937_v30 = vld [vmem:[#allocation7 + $0x8] sm:$0xff]  ;;  %v999_v50 = vmul.f32 32.0, %v1480_v49  ;;  %vm1003_vm8 = vweird.f32 %v1480_v49 }
 0x341   : > { %v1000_v51 = vsub.f32 1.0, %v999_v50 }
 0x343   : > { %v1001_v52 = vmul.f32 %v1480_v49, %v1000_v51 }
 0x344   : > { %v865_v20 = vpop.f32.mrf.mxu2  ;;  %v837_v21 = vpop.permute.xlu1 %836 }
 0x345   : > { %v842_v22 = vmul.f32 %v837_v21, %v818_v19  ;;  %v1002_v53 = vadd.f32 %v1480_v49, %v1001_v52 }
 0x347   : > { %v927_v23 = vadd.f32 %v920_v55, %v842_v22  ;;  %v1004_v54 = vsel %vm1003_vm8, %v1480_v49, %v1002_v53  ;;  %v1452_v22 = vld [vmem:[%s2034_s7] ss:$0 sm:$0xff] }
 0x349   : > { %931 = vst.msk [vmem:[#allocation7 + $0x18] sm:$0xff] %vm634_vm2, %v927_v23 }
 0x350   : > { %v939_v27 = vld [vmem:[#allocation7 + $0x18] sm:$0xff] }
 0x371   : > { %v961_v24 = vpop.permute.xlu2 %960 }
 0x372   : > { %v970_v26 = vmul.f32 %v961_v24, %v938_v25 }
 0x374   : > { %980 = vrot.lane.b32.xlu0 %v970_v26, %s1646_s15 }
 0x391   : > { %v966_v28 = vpop.permute.xlu1 %965 }
 0x392   : > { %v971_v29 = vmul.f32 %v966_v28, %v939_v27 }
 0x394   : > { %986 = vrot.lane.b32.xlu2 %v971_v29, %s1647_s13 }
 0x398   : > { %v951_v37 = vpop.permute.xlu2 %950 }
 0x3a8   : > { %v956_v32 = vpop.permute.xlu0 %955 }
 0x3a9   : > { %v969_v33 = vmul.f32 %v956_v32, %v937_v30 }
 0x3ab   : > { %974 = vrot.lane.b32.xlu1 %v969_v33, %s1648_s19  ;;  %s2059_s19 = sld [smem:[#allocation23_spill]] }
 0x3b0   : > { %v822_v34 = vpop.permute.xlu0 %821 }
 0x3b1   : > { %v839_v35 = vmul.f32 %v822_v34, %v815_v31 }
 0x3b3   : > { %v924_v36 = vadd.f32 %v863_v16, %v839_v35  ;;  %v1451_v16 = vld [vmem:[%s2032_s5] ss:$0 sm:$0xff] }
 0x3b5   : > { %928 = vst.msk [vmem:[#allocation7] sm:$0xff] %vm634_vm2, %v924_v36 }
 0x3bc   : > { %v936_v39 = vld [vmem:[#allocation7] sm:$0xff] }
 0x3bd   : > { %v968_v40 = vmul.f32 %v951_v37, %v936_v39 }
 0x3bf   : > { %972 = vst.msk [vmem:[#allocation8] sm:$0xff] %vm634_vm2, %v968_v40 }
 0x3e6   : > { %v981_v42 = vpop.permute.xlu0 %980 }
 0x3ee   : > { %v987_v44 = vpop.permute.xlu2 %986 }
 0x41d   : > { %v975_v41 = vpop.permute.xlu1 %974 }
 0x41e   : > { %978 = vst.msk [vmem:[#allocation8] sm:$0xff] %vm977_vm5, %v975_v41 }
 0x41f   : > { %984 = vst.msk [vmem:[#allocation8] sm:$0xff] %vm983_vm6, %v981_v42 }
 0x420   : > { %990 = vst.msk [vmem:[#allocation8] sm:$0xff] %vm989_vm7, %v987_v44  ;;  %v1453_v44 = vld [vmem:[%s2057_s10] ss:$0 sm:$0xff] }
 0x427   : > { %v991_v45 = vld [vmem:[#allocation8] sm:$0xff] }
 0x428   : > { %v992_v46 = vadd.f32 %v991_v45, %v1837_v4  ;;  %v1352_v4 = vld [vmem:[#allocation12 + $0x8] sm:$0xff] }
 0x429   : > { %1062 = vmatpush.bf16.msra.mxu2 %v1352_v4 }
 0x42a   : > { %v995_v47 = vsel %vm512_vm0, %v992_v46, 0.0 }
 0x42b   : > { %996 = vadd.xlane.f32.xlu1 %v995_v47  ;;  %v1454_v47 = vld [vmem:[%s2059_s19] ss:$0 sm:$0xff] }
 0x42d   : > { %1063 = vmatpush.bf16.msra.mxu2 %v1351_v60 }
 0x49e   : > { %v997_v55 = vpop.xlane.xlu1 %996 }
 0x49f   : > { %v1005_v56 = vmul.f32 %v1004_v54, %v997_v55 }
 0x4a1   : > { %v1006_v57 = vsub.f32 %v992_v46, %v1005_v56 }
 0x4a3   : > { %v1007_v58 = vmul.f32 %v1006_v57, %v1006_v57 }
 0x4a5   : > { %v1008_v59 = vsel %vm512_vm0, %v1007_v58, 0.0 }
 0x4a6   : > { %1009 = vadd.xlane.f32.xlu0 %v1008_v59 }
 0x519   : > { %v1010_v62 = vpop.xlane.xlu0 %1009 }
 0x51a   : > { %v1011_v63 = vmul.f32 %v1010_v62, %v1004_v54 }
 0x51c   : > { %v1012_v1 = vadd.f32 1e-05, %v1011_v63 }
 0x51e   : > { %1481 = vrsqrt.f32 %v1012_v1  ;;  %vm1019_vm10 = vweird.f32 %v1012_v1 }
 0x524   : > { %v1482_v3 = vpop.eup %1481 }
 0x525   : > { %v1014_v5 = vmul.f32 %v1482_v3, %v1012_v1  ;;  %vm1020_vm9 = vweird.f32 %v1482_v3 }
 0x526   : > { %vm1021_vm11 = vmor %vm1019_vm10, %vm1020_vm9 }
 0x527   : > { %v1015_v6 = vmul.f32 %v1482_v3, %v1014_v5 }
 0x529   : > { %v1016_v38 = vmul.f32 0.5, %v1015_v6 }
 0x52b   : > { %v1017_v43 = vsub.f32 1.5, %v1016_v38 }
 0x52d   : > { %v1018_v7 = vmul.f32 %v1482_v3, %v1017_v43 }
 0x52f   : > { %v1022_v9 = vsel %vm1021_vm11, %v1482_v3, %v1018_v7 }
 0x530   : > { %v1023_v11 = vmul.f32 %v1022_v9, %v1006_v57 }
 0x532   : > { %v1027_v12 = vmul.f32 %v1449_v8, %v1023_v11 }
 0x534   : > { %v1031_v13 = vadd.f32 %v1450_v10, %v1027_v12 }
 0x536   : > { %v1032_v14 = vpack.c.bf16 %v1031_v13, %v1031_v13 }
 0x538   : > { %1325 = vmatmul.msk.bf16.vlgmr.msra.gmra.mxu2 %vm512_vm0, %v1032_v14 }
 0x5bb   : > { %v1065_v17 = vpop.f32.mrf.mxu2 }
 0x5bc   : > { %v1066_v18 = vadd.f32 %v1451_v16, %v1065_v17 }
 0x5be   : > { %v1069_v19 = vmax.f32 %v1066_v18, 0.0 }
 0x5c0   : > { %v1070_v20 = vpack.c.bf16 %v1069_v19, %v1069_v19 }
 0x5c2   : > { %1342 = vmatmul.msk.bf16.vlgmr.msra.gmra.mxu3 %vm1107_vm12, %v1070_v20 }
 0x5c3   : > { %v1067_v21 = vpop.f32.mrf.mxu2 }
 0x645   : > { %v1120_v23 = vpop.f32.mrf.mxu3 }
 0x646   : > { %v1121_v24 = vadd.f32 %v1452_v22, %v1120_v23 }
 0x648   : > { %v1124_v25 = vadd.f32 %v1121_v24, %v1031_v13 }
 0x64a   : > { %v1127_v26 = vsel %vm512_vm0, %v1124_v25, 0.0 }
 0x64b   : > { %1128 = vadd.xlane.f32.xlu2 %v1127_v26 }
 0x64d   : > { %v1122_v27 = vpop.f32.mrf.mxu3 }
 0x6be   : > { %v1129_v28 = vpop.xlane.xlu2 %1128 }
 0x6bf   : > { %v1130_v29 = vmul.f32 %v1129_v28, %v1004_v54 }
 0x6c1   : > { %v1131_v30 = vsub.f32 %v1124_v25, %v1130_v29 }
 0x6c3   : > { %v1132_v32 = vmul.f32 %v1131_v30, %v1131_v30 }
 0x6c5   : > { %v1133_v33 = vsel %vm512_vm0, %v1132_v32, 0.0 }
 0x6c6   : > { %1134 = vadd.xlane.f32.xlu1 %v1133_v33 }
 0x739   : > { %v1135_v31 = vpop.xlane.xlu1 %1134 }
 0x73a   : > { %v1136_v34 = vmul.f32 %v1135_v31, %v1004_v54 }
 0x73c   : > { %v1137_v35 = vadd.f32 1e-05, %v1136_v34 }
 0x73e   : > { %1483 = vrsqrt.f32 %v1137_v35  ;;  %vm1144_vm14 = vweird.f32 %v1137_v35 }
 0x744   : > { %v1484_v36 = vpop.eup %1483 }
 0x745   : > { %v1139_v37 = vmul.f32 %v1484_v36, %v1137_v35  ;;  %vm1145_vm13 = vweird.f32 %v1484_v36 }
 0x746   : > { %vm1146_vm15 = vmor %vm1144_vm14, %vm1145_vm13 }
 0x747   : > { %v1140_v39 = vmul.f32 %v1484_v36, %v1139_v37 }
 0x749   : > { %v1141_v40 = vmul.f32 0.5, %v1140_v39 }
 0x74b   : > { %v1142_v41 = vsub.f32 1.5, %v1141_v40 }
 0x74d   : > { %v1143_v42 = vmul.f32 %v1484_v36, %v1142_v41 }
 0x74f   : > { %v1147_v45 = vsel %vm1146_vm15, %v1484_v36, %v1143_v42 }
 0x750   : > { %v1148_v46 = vmul.f32 %v1147_v45, %v1131_v30 }
 0x752   : > { %v1152_v48 = vmul.f32 %v1453_v44, %v1148_v46 }
 0x754   : > { %v1156_v49 = vadd.f32 %v1454_v47, %v1152_v48 }
 0x756   : > { %1157 = vst.msk [vmem:[%s482_s24] sm:$0xff] %vm512_vm0, %v1156_v49 }
 0x757   : > { %1572 = shalt.err (!%p1569_p0)
}
 0x758   : > { %1363 = dma.vmem_to_hbm [thread:$0]  (%p1786_p4), %s1173_s29, 128, %s1175_s28, %s1159_s4  }
 0x759 PF: > { %s2060_s17 = sld [smem:[#allocation18_spill]]  ;;  %p1374_p2 = pnand %p1283_p6, %p1794_p7 }
 0x75b   : > { %p1375_p5 = pneg %p1374_p2 }
 0x75f   : > { %s1186_s15 = sand.u32 1, %s2060_s17  }
 0x760   : > { %s1187_s13 = scalar_lea.sflag [#allocation11], %s1186_s15 }
 0x761   : > { %1606 = dma.done.wait (%p1375_p5), %s1187_s13, 128  }
 0x762   : > { %1608 = vsyncadd (%p1375_p5), %s1187_s13, 4294967168  ;;  %s29_s26 = sadd.s32 1, %s1631_s26   ;;  %s2061_s19 = sld [smem:[#allocation20_spill]] }
 0x763   : > { %p26_p8 = scmp.ge.s32.totalorder %s29_s26, 4   ;;  %s2062_s16 = sld [smem:[#allocation19_spill]] }
 0x764   : > { %s2063_s21 = smov %s1615_s22  ;;  %s2064_s22 = smov %s1619_s23 }
 0x765   : > { %s2066_s24 = smov %s1627_s25  ;;  %28 = sbr.rel (!%p26_p8) target bundleno = 12 (0xc), region = 133 }
 0x768   : > { %s2065_s23 = smov %s2061_s19 }
 0x769   : > { %s2067_s25 = smov %s2062_s16 }
 0x76a   :  { %1193 = vsyncpa [#allocation10], 1 }
 0x76b   :  { %1195 = vsyncpa [#allocation10 + $0x1], 1 }
 0x76c   :  { %1196 = vsyncpa [#allocation13], 1 }
 0x76d   :  { %1197 = vsyncpa [#allocation11], 1 }
 0x76e   :  { %1199 = vsyncpa [#allocation11 + $0x1], 1 }

</bundles_post_ra>
